<compile_context>
chip_gen: v7x
topology: tpu7x:2x2x1
jax: 0.10.0
libtpu: 0.0.40
codegen_flags: <defaults>
</compile_context>

<pallas_src>
import functools

import jax
import jax.numpy as jnp
from jax import lax
from jax.experimental import pallas as pl
from jax.experimental.pallas import tpu as pltpu


def _round_up(n, m):
    return (n + m - 1) // m * m


# ---------------------------------------------------------------------------
# Fused kernel: per grid step (batch shard b, time chunk c)
#   1) preact = x_chunk @ W_ih^T + bias            (time-parallel, one matmul)
#   2) serial recurrence over the chunk's timesteps (W_hh^T VMEM-resident)
# h / c carries live in VMEM scratch; hn / cn written on the last chunk.
# ---------------------------------------------------------------------------
def _lstm_fused_kernel(x_ref, wih_ref, whh_ref, b_ref, hn_ref, cn_ref,
                       pre_sc, h_sc, c_sc, *, seq_len, unroll):
    chunk = pl.program_id(1)

    @pl.when(chunk == 0)
    def _():
        h_sc[...] = jnp.zeros_like(h_sc)
        c_sc[...] = jnp.zeros_like(c_sc)

    tc, bs, i_pad = x_ref.shape
    h_pad = h_sc.shape[-1]          # padded hidden, multiple of 128 (lane-aligned)
    gh = whh_ref.shape[-1]          # 4 * h_pad

    # --- fused time-parallel input projection for this chunk (one MXU call) ---
    x_flat = x_ref[...].reshape(tc * bs, i_pad)
    pre = jnp.dot(x_flat, wih_ref[...],
                  preferred_element_type=jnp.float32) + b_ref[...]
    pre_sc[...] = pre.reshape(tc, bs, gh)

    whh = whh_ref[...]              # resident across the whole grid
    t0 = chunk * tc                 # first global timestep of this chunk

    def step(t, carry):
        h, c = carry
        gates = pre_sc[t] + jnp.dot(h, whh, preferred_element_type=jnp.float32)
        i_g = jax.nn.sigmoid(gates[:, 0 * h_pad:1 * h_pad])
        f_g = jax.nn.sigmoid(gates[:, 1 * h_pad:2 * h_pad])
        g_g = jnp.tanh(gates[:, 2 * h_pad:3 * h_pad])
        o_g = jax.nn.sigmoid(gates[:, 3 * h_pad:4 * h_pad])
        c_new = f_g * c + i_g * g_g
        h_new = (o_g * jnp.tanh(c_new)).astype(h.dtype)
        if seq_len is not None:     # masked tail: S not a multiple of t_chunk
            valid = (t0 + t) < seq_len
            h_new = jnp.where(valid, h_new, h)
            c_new = jnp.where(valid, c_new, c)
        return h_new, c_new

    h, c = lax.fori_loop(0, tc, step, (h_sc[...], c_sc[...]), unroll=unroll)
    h_sc[...] = h
    c_sc[...] = c

    @pl.when(chunk == pl.num_programs(1) - 1)
    def _():
        hn_ref[...] = h[None].astype(hn_ref.dtype)
        cn_ref[...] = c[None].astype(cn_ref.dtype)


# ---------------------------------------------------------------------------
# Weight preprocessing (hoist/cache this in inference loops — weights are
# static, so it only needs to run once per parameter set).
# ---------------------------------------------------------------------------
def prepare_lstm_weights(w_ih, w_hh, b_ih, b_hh, *, compute_dtype=jnp.bfloat16):
    """w_ih: (4H, I); w_hh: (4H, H); biases: (4H,). Pads each gate block
    separately so the i/f/g/o slices stay lane-aligned."""
    G = 4
    H = w_hh.shape[1]
    I = w_ih.shape[1]
    H_pad = _round_up(H, 128)
    I_pad = _round_up(I, 128)
    GH = G * H_pad

    wih = jnp.asarray(w_ih, jnp.float32).reshape(G, H, I)
    wih = jnp.pad(wih, ((0, 0), (0, H_pad - H), (0, I_pad - I)))
    wih_t = wih.transpose(2, 0, 1).reshape(I_pad, GH).astype(compute_dtype)

    whh = jnp.asarray(w_hh, jnp.float32).reshape(G, H, H)
    whh = jnp.pad(whh, ((0, 0), (0, H_pad - H), (0, H_pad - H)))
    whh_t = whh.transpose(2, 0, 1).reshape(H_pad, GH).astype(compute_dtype)

    bias = (jnp.asarray(b_ih, jnp.float32)
            + jnp.asarray(b_hh, jnp.float32)).reshape(G, H)
    bias = jnp.pad(bias, ((0, 0), (0, H_pad - H))).reshape(1, GH)  # f32

    return {"wih_t": wih_t, "whh_t": whh_t, "bias": bias,
            "hidden_size": H, "input_size": I}


def lstm_encoder_apply(x, params, *, t_chunk=16, unroll_cap=8, batch_shards=None):
    """x: (S, B, I). Returns (hn, cn), each (1, B, H) in float32."""
    S, B, I = x.shape
    wih_t, whh_t, bias = params["wih_t"], params["whh_t"], params["bias"]
    H = params["hidden_size"]
    assert I == params["input_size"]

    compute_dtype = wih_t.dtype
    is_bf16 = jnp.dtype(compute_dtype) == jnp.dtype(jnp.bfloat16)
    I_pad, GH = wih_t.shape
    H_pad = whh_t.shape[0]

    # Sublane alignment: bf16 packs 16 rows per vreg tile, f32 packs 8.
    B_align = 16 if is_bf16 else 8

    # Optional batch-shard "parallel" axis: splits the serial recurrence across
    # TensorCores on v7x (and is correct — just serial — on single-core chips).
    if batch_shards is None:
        batch_shards = 2 if B >= 2 * B_align else 1
    B_shard = _round_up(-(-B // batch_shards), B_align)
    B_pad = batch_shards * B_shard

    # Fixed time chunk + masked tail (no degenerate tc=1 for awkward S).
    tc = max(1, min(t_chunk, S))
    n_chunks = -(-S // tc)
    S_pad = n_chunks * tc
    seq_len = None if S_pad == S else S
    # Cap unroll so the (B_pad, 4*H_pad) per-step gates don't spill vregs.
    unroll = tc if H_pad <= 256 else max(1, min(tc, unroll_cap))

    xp = jnp.pad(jnp.asarray(x, jnp.float32),
                 ((0, S_pad - S), (0, B_pad - B), (0, I_pad - I)))
    xp = xp.astype(compute_dtype)

    comp_bytes = jnp.dtype(compute_dtype).itemsize
    # VMEM budget: double-buffered resident weights + streamed x blocks +
    # output blocks + scratch (preact, h, c), with headroom.
    resident = (I_pad + H_pad) * GH * comp_bytes + GH * 4
    streamed = tc * B_shard * I_pad * comp_bytes
    outputs = 2 * B_shard * H_pad * 4
    scratch = tc * B_shard * GH * 4 + B_shard * H_pad * (comp_bytes + 4)
    needed = 2 * resident + 2 * streamed + 2 * outputs + scratch
    vmem_limit = int(min(max(2 * needed + (4 << 20), 32 << 20), 120 << 20))

    kernel = functools.partial(_lstm_fused_kernel, seq_len=seq_len, unroll=unroll)

    hn, cn = pl.pallas_call(
        kernel,
        out_shape=(
            jax.ShapeDtypeStruct((1, B_pad, H_pad), jnp.float32),
            jax.ShapeDtypeStruct((1, B_pad, H_pad), jnp.float32),
        ),
        grid_spec=pltpu.PrefetchScalarGridSpec(
            num_scalar_prefetch=0,
            grid=(batch_shards, n_chunks),
            in_specs=[
                # streamed x chunk: (tc, B_shard, I_pad)
                pl.BlockSpec((tc, B_shard, I_pad), lambda b, c: (c, b, 0)),
                # resident weights / bias (constant block index => stays in VMEM)
                pl.BlockSpec((I_pad, GH), lambda b, c: (0, 0)),
                pl.BlockSpec((H_pad, GH), lambda b, c: (0, 0)),
                pl.BlockSpec((1, GH), lambda b, c: (0, 0)),
            ],
            out_specs=[
                pl.BlockSpec((1, B_shard, H_pad), lambda b, c: (0, b, 0)),
                pl.BlockSpec((1, B_shard, H_pad), lambda b, c: (0, b, 0)),
            ],
            scratch_shapes=[
                pltpu.VMEM((tc, B_shard, GH), jnp.float32),     # chunk preact
                pltpu.VMEM((B_shard, H_pad), compute_dtype),    # h carry
                pltpu.VMEM((B_shard, H_pad), jnp.float32),      # c carry
            ],
        ),
        compiler_params=pltpu.CompilerParams(
            dimension_semantics=("parallel", "arbitrary"),
            vmem_limit_bytes=vmem_limit,
        ),
        cost_estimate=pl.CostEstimate(
            flops=2 * S_pad * B_pad * GH * (I_pad + H_pad)
                  + 10 * S_pad * B_pad * H_pad,
            transcendentals=5 * S_pad * B_pad * H_pad,
            bytes_accessed=S_pad * B_pad * I_pad * comp_bytes
                           + (I_pad + H_pad) * GH * comp_bytes + GH * 4
                           + 2 * B_pad * H_pad * 4,
        ),
    )(xp, wih_t, whh_t, bias)

    return hn[:, :B, :H], cn[:, :B, :H]


def lstm_encoder_forward(x, w_ih, w_hh, b_ih, b_hh, *,
                         compute_dtype=jnp.bfloat16,  # bf16 MXU on v5e/v6e/v7x
                         t_chunk=16, unroll_cap=8, batch_shards=None):
    params = prepare_lstm_weights(w_ih, w_hh, b_ih, b_hh,
                                  compute_dtype=compute_dtype)
    return lstm_encoder_apply(x, params, t_chunk=t_chunk,
                              unroll_cap=unroll_cap, batch_shards=batch_shards)


# ---------------------------------------------------------------------------
# Pure-JAX reference mirroring torch.nn.LSTM (single layer, zero init state).
# ---------------------------------------------------------------------------
def _reference_lstm(x, w_ih, w_hh, b_ih, b_hh):
    S, B, I = x.shape
    H = w_hh.shape[1]
    b = b_ih + b_hh

    def step(carry, x_t):
        h, c = carry
        gates = x_t @ w_ih.T + h @ w_hh.T + b
        i_g = jax.nn.sigmoid(gates[:, 0 * H:1 * H])
        f_g = jax.nn.sigmoid(gates[:, 1 * H:2 * H])
        g_g = jnp.tanh(gates[:, 2 * H:3 * H])
        o_g = jax.nn.sigmoid(gates[:, 3 * H:4 * H])
        c_new = f_g * c + i_g * g_g
        h_new = o_g * jnp.tanh(c_new)
        return (h_new, c_new), None

    h0 = jnp.zeros((B, H), jnp.float32)
    c0 = jnp.zeros((B, H), jnp.float32)
    (hn, cn), _ = jax.lax.scan(step, (h0, c0), x)
    return hn[None], cn[None]


def _make_case(key, S, B, I, H):
    kx, k1, k2, k3, k4 = jax.random.split(key, 5)
    bound = 1.0 / (H ** 0.5)  # torch nn.LSTM init scheme
    w_ih = jax.random.uniform(k1, (4 * H, I), jnp.float32, -bound, bound)
    w_hh = jax.random.uniform(k2, (4 * H, H), jnp.float32, -bound, bound)
    b_ih = jax.random.uniform(k3, (4 * H,), jnp.float32, -bound, bound)
    b_hh = jax.random.uniform(k4, (4 * H,), jnp.float32, -bound, bound)
    x = jax.random.normal(kx, (S, B, I), jnp.float32)
    return x, w_ih, w_hh, b_ih, b_hh


if __name__ == "__main__":
    key = jax.random.PRNGKey(0)
    k_a, k_c = jax.random.split(key)

    # --- Case A/B: spec-sized shapes (seq=8, batch=2, input=16, hidden=32) ---
    SEQ, BATCH, INPUT_SIZE, HIDDEN_SIZE = 8, 2, 16, 32
    x, w_ih, w_hh, b_ih, b_hh = _make_case(k_a, SEQ, BATCH, INPUT_SIZE, HIDDEN_SIZE)
    hn_ref, cn_ref = _reference_lstm(x, w_ih, w_hh, b_ih, b_hh)

    # A) float32 path — tight tolerance.
    hn, cn = lstm_encoder_forward(x, w_ih, w_hh, b_ih, b_hh,
                                  compute_dtype=jnp.float32)
    jax.block_until_ready((hn, cn))
    assert hn.shape == (1, BATCH, HIDDEN_SIZE) and cn.shape == (1, BATCH, HIDDEN_SIZE)
    assert jnp.allclose(hn, hn_ref, atol=1e-5, rtol=1e-5)
    assert jnp.allclose(cn, cn_ref, atol=1e-5, rtol=1e-5)

    # B) bfloat16 path (default) — loose tolerance.
    hn, cn = lstm_encoder_forward(x, w_ih, w_hh, b_ih, b_hh)
    jax.block_until_ready((hn, cn))
    assert jnp.allclose(hn, hn_ref, atol=5e-2, rtol=5e-2)
    assert jnp.allclose(cn, cn_ref, atol=5e-2, rtol=5e-2)

    # C) awkward shapes: non-divisible S (masked tail), H not a multiple of 128,
    #    batch padding, and an explicit 2-way batch-shard grid axis.
    S2, B2, I2, H2 = 19, 5, 40, 96
    x2, w_ih2, w_hh2, b_ih2, b_hh2 = _make_case(k_c, S2, B2, I2, H2)
    hn2_ref, cn2_ref = _reference_lstm(x2, w_ih2, w_hh2, b_ih2, b_hh2)
    hn2, cn2 = lstm_encoder_forward(x2, w_ih2, w_hh2, b_ih2, b_hh2,
                                    t_chunk=8, batch_shards=2)
    jax.block_until_ready((hn2, cn2))
    assert hn2.shape == (1, B2, H2) and cn2.shape == (1, B2, H2)
    assert jnp.allclose(hn2, hn2_ref, atol=5e-2, rtol=5e-2)
    assert jnp.allclose(cn2, cn2_ref, atol=5e-2, rtol=5e-2)

    print("KERNEL_OK")
</pallas_src>

<mosaic_0001>
module attributes {stable_mosaic.version = 11 : i64} {
  func.func @_lstm_fused_kernel(%arg0: i32, %arg1: i32, %arg2: memref<8x8x128xf32, #tpu.memory_space<vmem>>, %arg3: memref<128x512xf32, #tpu.memory_space<vmem>>, %arg4: memref<128x512xf32, #tpu.memory_space<vmem>>, %arg5: memref<1x512xf32, #tpu.memory_space<vmem>>, %arg6: memref<1x8x128xf32, #tpu.memory_space<vmem>>, %arg7: memref<1x8x128xf32, #tpu.memory_space<vmem>>, %arg8: memref<8x8x512xf32, #tpu.memory_space<vmem>>, %arg9: memref<8x128xf32, #tpu.memory_space<vmem>>, %arg10: memref<8x128xf32, #tpu.memory_space<vmem>>) attributes {dimension_semantics = [#tpu.dimension_semantics<parallel>, #tpu.dimension_semantics<arbitrary>], iteration_bounds = array<i64: 1, 1>, scalar_prefetch = 0 : i64, scratch_operands = 3 : i64, tpu.core_type = #tpu.core_type<tc>, window_params = [{transform_indices = @transform_0, window_bounds = array<i64: 8, 8, 128>}, {pipeline_mode = #tpu.pipeline_mode<synchronous>, transform_indices = @transform_1, window_bounds = array<i64: 128, 512>}, {pipeline_mode = #tpu.pipeline_mode<synchronous>, transform_indices = @transform_2, window_bounds = array<i64: 128, 512>}, {pipeline_mode = #tpu.pipeline_mode<synchronous>, transform_indices = @transform_3, window_bounds = array<i64: 1, 512>}, {transform_indices = @transform_4, window_bounds = array<i64: 1, 8, 128>}, {transform_indices = @transform_5, window_bounds = array<i64: 1, 8, 128>}]} {
    %c0_i32 = arith.constant 0 : i32
    %0 = arith.cmpi eq, %arg1, %c0_i32 : i32
    %1 = arith.extui %0 : i1 to i32
    %c0_i32_0 = arith.constant 0 : i32
    %2 = arith.cmpi ne, %1, %c0_i32_0 : i32
    scf.if %2 {
      %cst_71 = arith.constant 0.000000e+00 : f32
      %260 = vector.broadcast %cst_71 : f32 to vector<8x128xf32>
      %c0_72 = arith.constant 0 : index
      %c0_73 = arith.constant 0 : index
      %261 = vector.load %arg9[%c0_72, %c0_73] : memref<8x128xf32, #tpu.memory_space<vmem>>, vector<8x128xf32>
      tpu.vector_store %arg9[%c0_72, %c0_73], %260 {strides = array<i32>} : memref<8x128xf32, #tpu.memory_space<vmem>>, vector<8x128xf32>,
      %cst_74 = arith.constant 0.000000e+00 : f32
      %262 = vector.broadcast %cst_74 : f32 to vector<8x128xf32>
      %c0_75 = arith.constant 0 : index
      %c0_76 = arith.constant 0 : index
      %263 = vector.load %arg10[%c0_75, %c0_76] : memref<8x128xf32, #tpu.memory_space<vmem>>, vector<8x128xf32>
      tpu.vector_store %arg10[%c0_75, %c0_76], %262 {strides = array<i32>} : memref<8x128xf32, #tpu.memory_space<vmem>>, vector<8x128xf32>,
    } else {
    }
    %c0 = arith.constant 0 : index
    %c0_1 = arith.constant 0 : index
    %c0_2 = arith.constant 0 : index
    %3 = vector.load %arg2[%c0, %c0_1, %c0_2] : memref<8x8x128xf32, #tpu.memory_space<vmem>>, vector<8x8x128xf32>
    %4 = vector.shape_cast %3 : vector<8x8x128xf32> to vector<64x128xf32>
    %c0_3 = arith.constant 0 : index
    %c0_4 = arith.constant 0 : index
    %5 = vector.load %arg3[%c0_3, %c0_4] : memref<128x512xf32, #tpu.memory_space<vmem>>, vector<128x512xf32>
    %cst = arith.constant dense<0.000000e+00> : vector<64x512xf32>
    %6 = tpu.matmul %4, %5, %cst {dimension_numbers = #tpu.dot_dimension_numbers<[1], [0], [0], [1], [0, 0, 1, 1], [], []>} : vector<64x128xf32>, vector<128x512xf32>, vector<64x512xf32> -> vector<64x512xf32>
    %c0_5 = arith.constant 0 : index
    %c0_6 = arith.constant 0 : index
    %7 = vector.load %arg5[%c0_5, %c0_6] : memref<1x512xf32, #tpu.memory_space<vmem>>, vector<1x512xf32>
    %8 = vector.broadcast %7 : vector<1x512xf32> to vector<64x512xf32>
    %9 = arith.addf %6, %8 : vector<64x512xf32>
    %10 = vector.shape_cast %9 : vector<64x512xf32> to vector<8x8x512xf32>
    %c0_7 = arith.constant 0 : index
    %c0_8 = arith.constant 0 : index
    %c0_9 = arith.constant 0 : index
    %11 = vector.load %arg8[%c0_7, %c0_8, %c0_9] : memref<8x8x512xf32, #tpu.memory_space<vmem>>, vector<8x8x512xf32>
    tpu.vector_store %arg8[%c0_7, %c0_8, %c0_9], %10 {strides = array<i32>} : memref<8x8x512xf32, #tpu.memory_space<vmem>>, vector<8x8x512xf32>,
    %c0_10 = arith.constant 0 : index
    %c0_11 = arith.constant 0 : index
    %12 = vector.load %arg4[%c0_10, %c0_11] : memref<128x512xf32, #tpu.memory_space<vmem>>, vector<128x512xf32>
    %c0_12 = arith.constant 0 : index
    %c0_13 = arith.constant 0 : index
    %13 = vector.load %arg9[%c0_12, %c0_13] : memref<8x128xf32, #tpu.memory_space<vmem>>, vector<8x128xf32>
    %c0_14 = arith.constant 0 : index
    %c0_15 = arith.constant 0 : index
    %14 = vector.load %arg10[%c0_14, %c0_15] : memref<8x128xf32, #tpu.memory_space<vmem>>, vector<8x128xf32>
    %c0_i32_16 = arith.constant 0 : i32
    %15 = arith.index_cast %c0_i32_16 : i32 to index
    %c0_17 = arith.constant 0 : index
    %c0_18 = arith.constant 0 : index
    %16 = vector.load %arg8[%15, %c0_17, %c0_18] : memref<8x8x512xf32, #tpu.memory_space<vmem>>, vector<1x8x512xf32>
    %17 = vector.shape_cast %16 : vector<1x8x512xf32> to vector<8x512xf32>
    %cst_19 = arith.constant dense<0.000000e+00> : vector<8x512xf32>
    %18 = tpu.matmul %13, %12, %cst_19 {dimension_numbers = #tpu.dot_dimension_numbers<[1], [0], [0], [1], [0, 0, 1, 1], [], []>} : vector<8x128xf32>, vector<128x512xf32>, vector<8x512xf32> -> vector<8x512xf32>
    %19 = arith.addf %17, %18 : vector<8x512xf32>
    %20 = vector.extract_strided_slice %19 {offsets = [0, 0], sizes = [8, 128], strides = [1, 1]} : vector<8x512xf32> to vector<8x128xf32>
    %21 = arith.negf %20 : vector<8x128xf32>
    %22 = math.exp %21 : vector<8x128xf32>
    %cst_20 = arith.constant 1.000000e+00 : f32
    %23 = vector.broadcast %cst_20 : f32 to vector<8x128xf32>
    %24 = arith.addf %23, %22 : vector<8x128xf32>
    %25 = arith.divf %23, %24 : vector<8x128xf32>
    %26 = vector.extract_strided_slice %19 {offsets = [0, 128], sizes = [8, 128], strides = [1, 1]} : vector<8x512xf32> to vector<8x128xf32>
    %27 = arith.negf %26 : vector<8x128xf32>
    %28 = math.exp %27 : vector<8x128xf32>
    %cst_21 = arith.constant 1.000000e+00 : f32
    %29 = vector.broadcast %cst_21 : f32 to vector<8x128xf32>
    %30 = arith.addf %29, %28 : vector<8x128xf32>
    %31 = arith.divf %29, %30 : vector<8x128xf32>
    %32 = vector.extract_strided_slice %19 {offsets = [0, 256], sizes = [8, 128], strides = [1, 1]} : vector<8x512xf32> to vector<8x128xf32>
    %33 = math.tanh %32 : vector<8x128xf32>
    %34 = vector.extract_strided_slice %19 {offsets = [0, 384], sizes = [8, 128], strides = [1, 1]} : vector<8x512xf32> to vector<8x128xf32>
    %35 = arith.negf %34 : vector<8x128xf32>
    %36 = math.exp %35 : vector<8x128xf32>
    %cst_22 = arith.constant 1.000000e+00 : f32
    %37 = vector.broadcast %cst_22 : f32 to vector<8x128xf32>
    %38 = arith.addf %37, %36 : vector<8x128xf32>
    %39 = arith.divf %37, %38 : vector<8x128xf32>
    %40 = arith.mulf %31, %14 : vector<8x128xf32>
    %41 = arith.mulf %25, %33 : vector<8x128xf32>
    %42 = arith.addf %40, %41 : vector<8x128xf32>
    %43 = math.tanh %42 : vector<8x128xf32>
    %44 = arith.mulf %39, %43 : vector<8x128xf32>
    %c1_i32 = arith.constant 1 : i32
    %45 = arith.index_cast %c1_i32 : i32 to index
    %c0_23 = arith.constant 0 : index
    %c0_24 = arith.constant 0 : index
    %46 = vector.load %arg8[%45, %c0_23, %c0_24] : memref<8x8x512xf32, #tpu.memory_space<vmem>>, vector<1x8x512xf32>
    %47 = vector.shape_cast %46 : vector<1x8x512xf32> to vector<8x512xf32>
    %cst_25 = arith.constant dense<0.000000e+00> : vector<8x512xf32>
    %48 = tpu.matmul %44, %12, %cst_25 {dimension_numbers = #tpu.dot_dimension_numbers<[1], [0], [0], [1], [0, 0, 1, 1], [], []>} : vector<8x128xf32>, vector<128x512xf32>, vector<8x512xf32> -> vector<8x512xf32>
    %49 = arith.addf %47, %48 : vector<8x512xf32>
    %50 = vector.extract_strided_slice %49 {offsets = [0, 0], sizes = [8, 128], strides = [1, 1]} : vector<8x512xf32> to vector<8x128xf32>
    %51 = arith.negf %50 : vector<8x128xf32>
    %52 = math.exp %51 : vector<8x128xf32>
    %cst_26 = arith.constant 1.000000e+00 : f32
    %53 = vector.broadcast %cst_26 : f32 to vector<8x128xf32>
    %54 = arith.addf %53, %52 : vector<8x128xf32>
    %55 = arith.divf %53, %54 : vector<8x128xf32>
    %56 = vector.extract_strided_slice %49 {offsets = [0, 128], sizes = [8, 128], strides = [1, 1]} : vector<8x512xf32> to vector<8x128xf32>
    %57 = arith.negf %56 : vector<8x128xf32>
    %58 = math.exp %57 : vector<8x128xf32>
    %cst_27 = arith.constant 1.000000e+00 : f32
    %59 = vector.broadcast %cst_27 : f32 to vector<8x128xf32>
    %60 = arith.addf %59, %58 : vector<8x128xf32>
    %61 = arith.divf %59, %60 : vector<8x128xf32>
    %62 = vector.extract_strided_slice %49 {offsets = [0, 256], sizes = [8, 128], strides = [1, 1]} : vector<8x512xf32> to vector<8x128xf32>
    %63 = math.tanh %62 : vector<8x128xf32>
    %64 = vector.extract_strided_slice %49 {offsets = [0, 384], sizes = [8, 128], strides = [1, 1]} : vector<8x512xf32> to vector<8x128xf32>
    %65 = arith.negf %64 : vector<8x128xf32>
    %66 = math.exp %65 : vector<8x128xf32>
    %cst_28 = arith.constant 1.000000e+00 : f32
    %67 = vector.broadcast %cst_28 : f32 to vector<8x128xf32>
    %68 = arith.addf %67, %66 : vector<8x128xf32>
    %69 = arith.divf %67, %68 : vector<8x128xf32>
    %70 = arith.mulf %61, %42 : vector<8x128xf32>
    %71 = arith.mulf %55, %63 : vector<8x128xf32>
    %72 = arith.addf %70, %71 : vector<8x128xf32>
    %73 = math.tanh %72 : vector<8x128xf32>
    %74 = arith.mulf %69, %73 : vector<8x128xf32>
    %c2_i32 = arith.constant 2 : i32
    %75 = arith.index_cast %c2_i32 : i32 to index
    %c0_29 = arith.constant 0 : index
    %c0_30 = arith.constant 0 : index
    %76 = vector.load %arg8[%75, %c0_29, %c0_30] : memref<8x8x512xf32, #tpu.memory_space<vmem>>, vector<1x8x512xf32>
    %77 = vector.shape_cast %76 : vector<1x8x512xf32> to vector<8x512xf32>
    %cst_31 = arith.constant dense<0.000000e+00> : vector<8x512xf32>
    %78 = tpu.matmul %74, %12, %cst_31 {dimension_numbers = #tpu.dot_dimension_numbers<[1], [0], [0], [1], [0, 0, 1, 1], [], []>} : vector<8x128xf32>, vector<128x512xf32>, vector<8x512xf32> -> vector<8x512xf32>
    %79 = arith.addf %77, %78 : vector<8x512xf32>
    %80 = vector.extract_strided_slice %79 {offsets = [0, 0], sizes = [8, 128], strides = [1, 1]} : vector<8x512xf32> to vector<8x128xf32>
    %81 = arith.negf %80 : vector<8x128xf32>
    %82 = math.exp %81 : vector<8x128xf32>
    %cst_32 = arith.constant 1.000000e+00 : f32
    %83 = vector.broadcast %cst_32 : f32 to vector<8x128xf32>
    %84 = arith.addf %83, %82 : vector<8x128xf32>
    %85 = arith.divf %83, %84 : vector<8x128xf32>
    %86 = vector.extract_strided_slice %79 {offsets = [0, 128], sizes = [8, 128], strides = [1, 1]} : vector<8x512xf32> to vector<8x128xf32>
    %87 = arith.negf %86 : vector<8x128xf32>
    %88 = math.exp %87 : vector<8x128xf32>
    %cst_33 = arith.constant 1.000000e+00 : f32
    %89 = vector.broadcast %cst_33 : f32 to vector<8x128xf32>
    %90 = arith.addf %89, %88 : vector<8x128xf32>
    %91 = arith.divf %89, %90 : vector<8x128xf32>
    %92 = vector.extract_strided_slice %79 {offsets = [0, 256], sizes = [8, 128], strides = [1, 1]} : vector<8x512xf32> to vector<8x128xf32>
    %93 = math.tanh %92 : vector<8x128xf32>
    %94 = vector.extract_strided_slice %79 {offsets = [0, 384], sizes = [8, 128], strides = [1, 1]} : vector<8x512xf32> to vector<8x128xf32>
    %95 = arith.negf %94 : vector<8x128xf32>
    %96 = math.exp %95 : vector<8x128xf32>
    %cst_34 = arith.constant 1.000000e+00 : f32
    %97 = vector.broadcast %cst_34 : f32 to vector<8x128xf32>
    %98 = arith.addf %97, %96 : vector<8x128xf32>
    %99 = arith.divf %97, %98 : vector<8x128xf32>
    %100 = arith.mulf %91, %72 : vector<8x128xf32>
    %101 = arith.mulf %85, %93 : vector<8x128xf32>
    %102 = arith.addf %100, %101 : vector<8x128xf32>
    %103 = math.tanh %102 : vector<8x128xf32>
    %104 = arith.mulf %99, %103 : vector<8x128xf32>
    %c3_i32 = arith.constant 3 : i32
    %105 = arith.index_cast %c3_i32 : i32 to index
    %c0_35 = arith.constant 0 : index
    %c0_36 = arith.constant 0 : index
    %106 = vector.load %arg8[%105, %c0_35, %c0_36] : memref<8x8x512xf32, #tpu.memory_space<vmem>>, vector<1x8x512xf32>
    %107 = vector.shape_cast %106 : vector<1x8x512xf32> to vector<8x512xf32>
    %cst_37 = arith.constant dense<0.000000e+00> : vector<8x512xf32>
    %108 = tpu.matmul %104, %12, %cst_37 {dimension_numbers = #tpu.dot_dimension_numbers<[1], [0], [0], [1], [0, 0, 1, 1], [], []>} : vector<8x128xf32>, vector<128x512xf32>, vector<8x512xf32> -> vector<8x512xf32>
    %109 = arith.addf %107, %108 : vector<8x512xf32>
    %110 = vector.extract_strided_slice %109 {offsets = [0, 0], sizes = [8, 128], strides = [1, 1]} : vector<8x512xf32> to vector<8x128xf32>
    %111 = arith.negf %110 : vector<8x128xf32>
    %112 = math.exp %111 : vector<8x128xf32>
    %cst_38 = arith.constant 1.000000e+00 : f32
    %113 = vector.broadcast %cst_38 : f32 to vector<8x128xf32>
    %114 = arith.addf %113, %112 : vector<8x128xf32>
    %115 = arith.divf %113, %114 : vector<8x128xf32>
    %116 = vector.extract_strided_slice %109 {offsets = [0, 128], sizes = [8, 128], strides = [1, 1]} : vector<8x512xf32> to vector<8x128xf32>
    %117 = arith.negf %116 : vector<8x128xf32>
    %118 = math.exp %117 : vector<8x128xf32>
    %cst_39 = arith.constant 1.000000e+00 : f32
    %119 = vector.broadcast %cst_39 : f32 to vector<8x128xf32>
    %120 = arith.addf %119, %118 : vector<8x128xf32>
    %121 = arith.divf %119, %120 : vector<8x128xf32>
    %122 = vector.extract_strided_slice %109 {offsets = [0, 256], sizes = [8, 128], strides = [1, 1]} : vector<8x512xf32> to vector<8x128xf32>
    %123 = math.tanh %122 : vector<8x128xf32>
    %124 = vector.extract_strided_slice %109 {offsets = [0, 384], sizes = [8, 128], strides = [1, 1]} : vector<8x512xf32> to vector<8x128xf32>
    %125 = arith.negf %124 : vector<8x128xf32>
    %126 = math.exp %125 : vector<8x128xf32>
    %cst_40 = arith.constant 1.000000e+00 : f32
    %127 = vector.broadcast %cst_40 : f32 to vector<8x128xf32>
    %128 = arith.addf %127, %126 : vector<8x128xf32>
    %129 = arith.divf %127, %128 : vector<8x128xf32>
    %130 = arith.mulf %121, %102 : vector<8x128xf32>
    %131 = arith.mulf %115, %123 : vector<8x128xf32>
    %132 = arith.addf %130, %131 : vector<8x128xf32>
    %133 = math.tanh %132 : vector<8x128xf32>
    %134 = arith.mulf %129, %133 : vector<8x128xf32>
    %c4_i32 = arith.constant 4 : i32
    %135 = arith.index_cast %c4_i32 : i32 to index
    %c0_41 = arith.constant 0 : index
    %c0_42 = arith.constant 0 : index
    %136 = vector.load %arg8[%135, %c0_41, %c0_42] : memref<8x8x512xf32, #tpu.memory_space<vmem>>, vector<1x8x512xf32>
    %137 = vector.shape_cast %136 : vector<1x8x512xf32> to vector<8x512xf32>
    %cst_43 = arith.constant dense<0.000000e+00> : vector<8x512xf32>
    %138 = tpu.matmul %134, %12, %cst_43 {dimension_numbers = #tpu.dot_dimension_numbers<[1], [0], [0], [1], [0, 0, 1, 1], [], []>} : vector<8x128xf32>, vector<128x512xf32>, vector<8x512xf32> -> vector<8x512xf32>
    %139 = arith.addf %137, %138 : vector<8x512xf32>
    %140 = vector.extract_strided_slice %139 {offsets = [0, 0], sizes = [8, 128], strides = [1, 1]} : vector<8x512xf32> to vector<8x128xf32>
    %141 = arith.negf %140 : vector<8x128xf32>
    %142 = math.exp %141 : vector<8x128xf32>
    %cst_44 = arith.constant 1.000000e+00 : f32
    %143 = vector.broadcast %cst_44 : f32 to vector<8x128xf32>
    %144 = arith.addf %143, %142 : vector<8x128xf32>
    %145 = arith.divf %143, %144 : vector<8x128xf32>
    %146 = vector.extract_strided_slice %139 {offsets = [0, 128], sizes = [8, 128], strides = [1, 1]} : vector<8x512xf32> to vector<8x128xf32>
    %147 = arith.negf %146 : vector<8x128xf32>
    %148 = math.exp %147 : vector<8x128xf32>
    %cst_45 = arith.constant 1.000000e+00 : f32
    %149 = vector.broadcast %cst_45 : f32 to vector<8x128xf32>
    %150 = arith.addf %149, %148 : vector<8x128xf32>
    %151 = arith.divf %149, %150 : vector<8x128xf32>
    %152 = vector.extract_strided_slice %139 {offsets = [0, 256], sizes = [8, 128], strides = [1, 1]} : vector<8x512xf32> to vector<8x128xf32>
    %153 = math.tanh %152 : vector<8x128xf32>
    %154 = vector.extract_strided_slice %139 {offsets = [0, 384], sizes = [8, 128], strides = [1, 1]} : vector<8x512xf32> to vector<8x128xf32>
    %155 = arith.negf %154 : vector<8x128xf32>
    %156 = math.exp %155 : vector<8x128xf32>
    %cst_46 = arith.constant 1.000000e+00 : f32
    %157 = vector.broadcast %cst_46 : f32 to vector<8x128xf32>
    %158 = arith.addf %157, %156 : vector<8x128xf32>
    %159 = arith.divf %157, %158 : vector<8x128xf32>
    %160 = arith.mulf %151, %132 : vector<8x128xf32>
    %161 = arith.mulf %145, %153 : vector<8x128xf32>
    %162 = arith.addf %160, %161 : vector<8x128xf32>
    %163 = math.tanh %162 : vector<8x128xf32>
    %164 = arith.mulf %159, %163 : vector<8x128xf32>
    %c5_i32 = arith.constant 5 : i32
    %165 = arith.index_cast %c5_i32 : i32 to index
    %c0_47 = arith.constant 0 : index
    %c0_48 = arith.constant 0 : index
    %166 = vector.load %arg8[%165, %c0_47, %c0_48] : memref<8x8x512xf32, #tpu.memory_space<vmem>>, vector<1x8x512xf32>
    %167 = vector.shape_cast %166 : vector<1x8x512xf32> to vector<8x512xf32>
    %cst_49 = arith.constant dense<0.000000e+00> : vector<8x512xf32>
    %168 = tpu.matmul %164, %12, %cst_49 {dimension_numbers = #tpu.dot_dimension_numbers<[1], [0], [0], [1], [0, 0, 1, 1], [], []>} : vector<8x128xf32>, vector<128x512xf32>, vector<8x512xf32> -> vector<8x512xf32>
    %169 = arith.addf %167, %168 : vector<8x512xf32>
    %170 = vector.extract_strided_slice %169 {offsets = [0, 0], sizes = [8, 128], strides = [1, 1]} : vector<8x512xf32> to vector<8x128xf32>
    %171 = arith.negf %170 : vector<8x128xf32>
    %172 = math.exp %171 : vector<8x128xf32>
    %cst_50 = arith.constant 1.000000e+00 : f32
    %173 = vector.broadcast %cst_50 : f32 to vector<8x128xf32>
    %174 = arith.addf %173, %172 : vector<8x128xf32>
    %175 = arith.divf %173, %174 : vector<8x128xf32>
    %176 = vector.extract_strided_slice %169 {offsets = [0, 128], sizes = [8, 128], strides = [1, 1]} : vector<8x512xf32> to vector<8x128xf32>
    %177 = arith.negf %176 : vector<8x128xf32>
    %178 = math.exp %177 : vector<8x128xf32>
    %cst_51 = arith.constant 1.000000e+00 : f32
    %179 = vector.broadcast %cst_51 : f32 to vector<8x128xf32>
    %180 = arith.addf %179, %178 : vector<8x128xf32>
    %181 = arith.divf %179, %180 : vector<8x128xf32>
    %182 = vector.extract_strided_slice %169 {offsets = [0, 256], sizes = [8, 128], strides = [1, 1]} : vector<8x512xf32> to vector<8x128xf32>
    %183 = math.tanh %182 : vector<8x128xf32>
    %184 = vector.extract_strided_slice %169 {offsets = [0, 384], sizes = [8, 128], strides = [1, 1]} : vector<8x512xf32> to vector<8x128xf32>
    %185 = arith.negf %184 : vector<8x128xf32>
    %186 = math.exp %185 : vector<8x128xf32>
    %cst_52 = arith.constant 1.000000e+00 : f32
    %187 = vector.broadcast %cst_52 : f32 to vector<8x128xf32>
    %188 = arith.addf %187, %186 : vector<8x128xf32>
    %189 = arith.divf %187, %188 : vector<8x128xf32>
    %190 = arith.mulf %181, %162 : vector<8x128xf32>
    %191 = arith.mulf %175, %183 : vector<8x128xf32>
    %192 = arith.addf %190, %191 : vector<8x128xf32>
    %193 = math.tanh %192 : vector<8x128xf32>
    %194 = arith.mulf %189, %193 : vector<8x128xf32>
    %c6_i32 = arith.constant 6 : i32
    %195 = arith.index_cast %c6_i32 : i32 to index
    %c0_53 = arith.constant 0 : index
    %c0_54 = arith.constant 0 : index
    %196 = vector.load %arg8[%195, %c0_53, %c0_54] : memref<8x8x512xf32, #tpu.memory_space<vmem>>, vector<1x8x512xf32>
    %197 = vector.shape_cast %196 : vector<1x8x512xf32> to vector<8x512xf32>
    %cst_55 = arith.constant dense<0.000000e+00> : vector<8x512xf32>
    %198 = tpu.matmul %194, %12, %cst_55 {dimension_numbers = #tpu.dot_dimension_numbers<[1], [0], [0], [1], [0, 0, 1, 1], [], []>} : vector<8x128xf32>, vector<128x512xf32>, vector<8x512xf32> -> vector<8x512xf32>
    %199 = arith.addf %197, %198 : vector<8x512xf32>
    %200 = vector.extract_strided_slice %199 {offsets = [0, 0], sizes = [8, 128], strides = [1, 1]} : vector<8x512xf32> to vector<8x128xf32>
    %201 = arith.negf %200 : vector<8x128xf32>
    %202 = math.exp %201 : vector<8x128xf32>
    %cst_56 = arith.constant 1.000000e+00 : f32
    %203 = vector.broadcast %cst_56 : f32 to vector<8x128xf32>
    %204 = arith.addf %203, %202 : vector<8x128xf32>
    %205 = arith.divf %203, %204 : vector<8x128xf32>
    %206 = vector.extract_strided_slice %199 {offsets = [0, 128], sizes = [8, 128], strides = [1, 1]} : vector<8x512xf32> to vector<8x128xf32>
    %207 = arith.negf %206 : vector<8x128xf32>
    %208 = math.exp %207 : vector<8x128xf32>
    %cst_57 = arith.constant 1.000000e+00 : f32
    %209 = vector.broadcast %cst_57 : f32 to vector<8x128xf32>
    %210 = arith.addf %209, %208 : vector<8x128xf32>
    %211 = arith.divf %209, %210 : vector<8x128xf32>
    %212 = vector.extract_strided_slice %199 {offsets = [0, 256], sizes = [8, 128], strides = [1, 1]} : vector<8x512xf32> to vector<8x128xf32>
    %213 = math.tanh %212 : vector<8x128xf32>
    %214 = vector.extract_strided_slice %199 {offsets = [0, 384], sizes = [8, 128], strides = [1, 1]} : vector<8x512xf32> to vector<8x128xf32>
    %215 = arith.negf %214 : vector<8x128xf32>
    %216 = math.exp %215 : vector<8x128xf32>
    %cst_58 = arith.constant 1.000000e+00 : f32
    %217 = vector.broadcast %cst_58 : f32 to vector<8x128xf32>
    %218 = arith.addf %217, %216 : vector<8x128xf32>
    %219 = arith.divf %217, %218 : vector<8x128xf32>
    %220 = arith.mulf %211, %192 : vector<8x128xf32>
    %221 = arith.mulf %205, %213 : vector<8x128xf32>
    %222 = arith.addf %220, %221 : vector<8x128xf32>
    %223 = math.tanh %222 : vector<8x128xf32>
    %224 = arith.mulf %219, %223 : vector<8x128xf32>
    %c7_i32 = arith.constant 7 : i32
    %225 = arith.index_cast %c7_i32 : i32 to index
    %c0_59 = arith.constant 0 : index
    %c0_60 = arith.constant 0 : index
    %226 = vector.load %arg8[%225, %c0_59, %c0_60] : memref<8x8x512xf32, #tpu.memory_space<vmem>>, vector<1x8x512xf32>
    %227 = vector.shape_cast %226 : vector<1x8x512xf32> to vector<8x512xf32>
    %cst_61 = arith.constant dense<0.000000e+00> : vector<8x512xf32>
    %228 = tpu.matmul %224, %12, %cst_61 {dimension_numbers = #tpu.dot_dimension_numbers<[1], [0], [0], [1], [0, 0, 1, 1], [], []>} : vector<8x128xf32>, vector<128x512xf32>, vector<8x512xf32> -> vector<8x512xf32>
    %229 = arith.addf %227, %228 : vector<8x512xf32>
    %230 = vector.extract_strided_slice %229 {offsets = [0, 0], sizes = [8, 128], strides = [1, 1]} : vector<8x512xf32> to vector<8x128xf32>
    %231 = arith.negf %230 : vector<8x128xf32>
    %232 = math.exp %231 : vector<8x128xf32>
    %cst_62 = arith.constant 1.000000e+00 : f32
    %233 = vector.broadcast %cst_62 : f32 to vector<8x128xf32>
    %234 = arith.addf %233, %232 : vector<8x128xf32>
    %235 = arith.divf %233, %234 : vector<8x128xf32>
    %236 = vector.extract_strided_slice %229 {offsets = [0, 128], sizes = [8, 128], strides = [1, 1]} : vector<8x512xf32> to vector<8x128xf32>
    %237 = arith.negf %236 : vector<8x128xf32>
    %238 = math.exp %237 : vector<8x128xf32>
    %cst_63 = arith.constant 1.000000e+00 : f32
    %239 = vector.broadcast %cst_63 : f32 to vector<8x128xf32>
    %240 = arith.addf %239, %238 : vector<8x128xf32>
    %241 = arith.divf %239, %240 : vector<8x128xf32>
    %242 = vector.extract_strided_slice %229 {offsets = [0, 256], sizes = [8, 128], strides = [1, 1]} : vector<8x512xf32> to vector<8x128xf32>
    %243 = math.tanh %242 : vector<8x128xf32>
    %244 = vector.extract_strided_slice %229 {offsets = [0, 384], sizes = [8, 128], strides = [1, 1]} : vector<8x512xf32> to vector<8x128xf32>
    %245 = arith.negf %244 : vector<8x128xf32>
    %246 = math.exp %245 : vector<8x128xf32>
    %cst_64 = arith.constant 1.000000e+00 : f32
    %247 = vector.broadcast %cst_64 : f32 to vector<8x128xf32>
    %248 = arith.addf %247, %246 : vector<8x128xf32>
    %249 = arith.divf %247, %248 : vector<8x128xf32>
    %250 = arith.mulf %241, %222 : vector<8x128xf32>
    %251 = arith.mulf %235, %243 : vector<8x128xf32>
    %252 = arith.addf %250, %251 : vector<8x128xf32>
    %253 = math.tanh %252 : vector<8x128xf32>
    %254 = arith.mulf %249, %253 : vector<8x128xf32>
    %c8_i32 = arith.constant 8 : i32
    %c0_65 = arith.constant 0 : index
    %c0_66 = arith.constant 0 : index
    %255 = vector.load %arg9[%c0_65, %c0_66] : memref<8x128xf32, #tpu.memory_space<vmem>>, vector<8x128xf32>
    tpu.vector_store %arg9[%c0_65, %c0_66], %254 {strides = array<i32>} : memref<8x128xf32, #tpu.memory_space<vmem>>, vector<8x128xf32>,
    %c0_67 = arith.constant 0 : index
    %c0_68 = arith.constant 0 : index
    %256 = vector.load %arg10[%c0_67, %c0_68] : memref<8x128xf32, #tpu.memory_space<vmem>>, vector<8x128xf32>
    tpu.vector_store %arg10[%c0_67, %c0_68], %252 {strides = array<i32>} : memref<8x128xf32, #tpu.memory_space<vmem>>, vector<8x128xf32>,
    %c0_i32_69 = arith.constant 0 : i32
    %257 = arith.cmpi eq, %arg1, %c0_i32_69 : i32
    %258 = arith.extui %257 : i1 to i32
    %c0_i32_70 = arith.constant 0 : i32
    %259 = arith.cmpi ne, %258, %c0_i32_70 : i32
    scf.if %259 {
      %260 = vector.shape_cast %254 : vector<8x128xf32> to vector<1x8x128xf32>
      %c0_71 = arith.constant 0 : index
      %c0_72 = arith.constant 0 : index
      %c0_73 = arith.constant 0 : index
      %261 = vector.load %arg6[%c0_71, %c0_72, %c0_73] : memref<1x8x128xf32, #tpu.memory_space<vmem>>, vector<1x8x128xf32>
      tpu.vector_store %arg6[%c0_71, %c0_72, %c0_73], %260 {strides = array<i32>} : memref<1x8x128xf32, #tpu.memory_space<vmem>>, vector<1x8x128xf32>,
      %262 = vector.shape_cast %252 : vector<8x128xf32> to vector<1x8x128xf32>
      %c0_74 = arith.constant 0 : index
      %c0_75 = arith.constant 0 : index
      %c0_76 = arith.constant 0 : index
      %263 = vector.load %arg7[%c0_74, %c0_75, %c0_76] : memref<1x8x128xf32, #tpu.memory_space<vmem>>, vector<1x8x128xf32>
      tpu.vector_store %arg7[%c0_74, %c0_75, %c0_76], %262 {strides = array<i32>} : memref<1x8x128xf32, #tpu.memory_space<vmem>>, vector<1x8x128xf32>,
    } else {
    }
    return
  }
  func.func @transform_0(%arg0: i32, %arg1: i32) -> (i32, i32, i32) {
    %c0_i32 = arith.constant 0 : i32
    %c0_i32_0 = arith.constant 0 : i32
    return %arg1, %arg0, %c0_i32 : i32, i32, i32
  }
  func.func @transform_1(%arg0: i32, %arg1: i32) -> (i32, i32) {
    %c0_i32 = arith.constant 0 : i32
    %c0_i32_0 = arith.constant 0 : i32
    %c0_i32_1 = arith.constant 0 : i32
    return %c0_i32, %c0_i32_0 : i32, i32
  }
  func.func @transform_2(%arg0: i32, %arg1: i32) -> (i32, i32) {
    %c0_i32 = arith.constant 0 : i32
    %c0_i32_0 = arith.constant 0 : i32
    %c0_i32_1 = arith.constant 0 : i32
    return %c0_i32, %c0_i32_0 : i32, i32
  }
  func.func @transform_3(%arg0: i32, %arg1: i32) -> (i32, i32) {
    %c0_i32 = arith.constant 0 : i32
    %c0_i32_0 = arith.constant 0 : i32
    %c0_i32_1 = arith.constant 0 : i32
    return %c0_i32, %c0_i32_0 : i32, i32
  }
  func.func @transform_4(%arg0: i32, %arg1: i32) -> (i32, i32, i32) {
    %c0_i32 = arith.constant 0 : i32
    %c0_i32_0 = arith.constant 0 : i32
    %c0_i32_1 = arith.constant 0 : i32
    return %c0_i32, %arg0, %c0_i32_0 : i32, i32, i32
  }
  func.func @transform_5(%arg0: i32, %arg1: i32) -> (i32, i32, i32) {
    %c0_i32 = arith.constant 0 : i32
    %c0_i32_0 = arith.constant 0 : i32
    %c0_i32_1 = arith.constant 0 : i32
    return %c0_i32, %arg0, %c0_i32_0 : i32, i32, i32
  }
}

</mosaic_0001>

<bundles_post_ra>
// kernel: tpu_custom_call.1
= control target key start
LH: loop header
LB: loop body
LE: loop exit
PB: predicated region body
PF: predicated region fallthrough
CT: control target
= control target key end

     0   :  { %11 = vsyncpa [#allocation6], 0  ;;  %s3369_s0 = inlined_call_operand.hbm [shape: f32[8,8,128], index: 0, kind: input, shape index: {}]   ;;  %s3370_s1 = inlined_call_operand.hbm [shape: f32[128,512], index: 1, kind: input, shape index: {}]   ;;  %s3371_s2 = inlined_call_operand.hbm [shape: f32[128,512], index: 2, kind: input, shape index: {}]   ;;  %s3372_s3 = inlined_call_operand.vmem [shape: f32[1,512], index: 3, kind: input, shape index: {}]   ;;  %s3373_s4 = inlined_call_operand.hbm [shape: f32[1,8,128], index: 4, kind: output, shape index: {0}]   ;;  %s3374_s5 = inlined_call_operand.hbm [shape: f32[1,8,128], index: 5, kind: output, shape index: {1}]  }
   0x1   :  { %12 = vsyncpa [#allocation9], 0 }
   0x2   :  { %13 = vsyncpa [#allocation7], 0 }
   0x3   :  { %14 = vsyncpa [#allocation13], 0  ;;  %s2842_s18 = smov [#allocation8]   ;;  %s2724_s22 = scalar_lea.hbm %s3370_s1, 8192 }
   0x4   :  { %s32_s19 = sshll.u32 %s2842_s18, 4  ;;  %p2725_p0 = scmp.ne.s32.totalorder %s3370_s1, %s2724_s22  ;;  %s33_s19 = int_to_ptr.vmem [resolvable:$true] %s32_s19 }
   0x5   :  { %p2728_p1 = scmp.lt.u32.totalorder %s2724_s22, %s3370_s1 }
   0x7   :  { %p2730_p2 = pnand %p2728_p1, %p2725_p0 }
   0x9   :  { %2733 = shalt.err (!%p2730_p2)
}
   0xa   :  { %s2734_s27 = scalar_lea.vmem %s33_s19, 8192  ;;  %p2739_p4 = scmp.lt.s32.totalorder %s33_s19, %s33_s19 }
   0xb   :  { %p2735_p3 = scmp.ne.s32.totalorder %s33_s19, %s2734_s27  ;;  %p2740_p5 = scmp.lt.s32.totalorder %s2734_s27, %s2734_s27 }
   0xd   :  { %p2741_p6 = por %p2740_p5, %p2739_p4 }
   0xf   :  { %p2742_p7 = pnand %p2741_p6, %p2735_p3 }
  0x11   :  { %2745 = shalt.err (!%p2742_p7)
}
  0x12   :  { %s2843_s28 = smov 512   ;;  %s2844_s29 = smov 32  }
  0x13   :  { %38 = dma.hbm_to_vmem [thread:$0]  %s3370_s1, 8192, %s33_s19, [#allocation9], %s2843_s28, %s2843_s28, %s2844_s29  }
  0x14   :  { %s2845_s7 = smov [#allocation5]   ;;  %s2746_s11 = scalar_lea.hbm %s3369_s0, 1024 }
  0x15   :  { %s20_s8 = sshll.u32 %s2845_s7, 4  ;;  %p2747_p8 = scmp.ne.s32.totalorder %s3369_s0, %s2746_s11  ;;  %s21_s8 = int_to_ptr.vmem [resolvable:$true] %s20_s8 }
  0x16   :  { %p2750_p9 = scmp.lt.u32.totalorder %s2746_s11, %s3369_s0 }
  0x18   :  { %p2752_p10 = pnand %p2750_p9, %p2747_p8 }
  0x1a   :  { %2755 = shalt.err (!%p2752_p10)
}
  0x1b   :  { %s2756_s16 = scalar_lea.vmem %s21_s8, 1024  ;;  %p2761_p12 = scmp.lt.s32.totalorder %s21_s8, %s21_s8 }
  0x1c   :  { %p2757_p11 = scmp.ne.s32.totalorder %s21_s8, %s2756_s16  ;;  %p2762_p13 = scmp.lt.s32.totalorder %s2756_s16, %s2756_s16 }
  0x1e   :  { %p2763_p0 = por %p2762_p13, %p2761_p12 }
  0x20   :  { %p2764_p1 = pnand %p2763_p0, %p2757_p11 }
  0x22   :  { %2767 = shalt.err (!%p2764_p1)
}
  0x23   :  { %s2846_s1 = smov 128   ;;  %s2847_s17 = smov 8  }
  0x24   :  { %26 = dma.hbm_to_vmem [thread:$0]  %s3369_s0, 1024, %s21_s8, [#allocation6], %s2846_s1, %s2846_s1, %s2847_s17  }
  0x25   :  { %s2848_s20 = smov [#allocation10]   ;;  %s2768_s24 = scalar_lea.hbm %s3371_s2, 8192 }
  0x26   :  { %s44_s21 = sshll.u32 %s2848_s20, 4  ;;  %p2769_p2 = scmp.ne.s32.totalorder %s3371_s2, %s2768_s24  ;;  %s45_s21 = int_to_ptr.vmem [resolvable:$true] %s44_s21 }
  0x27   :  { %p2772_p3 = scmp.lt.u32.totalorder %s2768_s24, %s3371_s2 }
  0x29   :  { %p2774_p4 = pnand %p2772_p3, %p2769_p2 }
  0x2b   :  { %2777 = shalt.err (!%p2774_p4)
}
  0x2c   :  { %s2778_s6 = scalar_lea.vmem %s45_s21, 8192  ;;  %p2783_p6 = scmp.lt.s32.totalorder %s45_s21, %s45_s21 }
  0x2d   :  { %p2779_p5 = scmp.ne.s32.totalorder %s45_s21, %s2778_s6  ;;  %p2784_p7 = scmp.lt.s32.totalorder %s2778_s6, %s2778_s6 }
  0x2f   :  { %p2785_p8 = por %p2784_p7, %p2783_p6 }
  0x31   :  { %p2786_p9 = pnand %p2785_p8, %p2779_p5 }
  0x33   :  { %2789 = shalt.err (!%p2786_p9)
}
  0x34   :  { %50 = dma.hbm_to_vmem [thread:$0]  %s3371_s2, 8192, %s45_s21, [#allocation9], %s2843_s28, %s2843_s28, %s2844_s29  }
  0x35   :  { %2834 = dma.done.wait [#allocation6], 1024  }
  0x36   :  { %2835 = vsyncadd [#allocation6], 4294966272 }
  0x37   :  { %2836 = dma.done.wait [#allocation9], 16384  }
  0x38   :  { %2837 = vsyncadd [#allocation9], 4294950912  ;;  %v2849_v0 = vmov 0.0   ;;  %v77_v1 = vld [vmem:[#allocation8 + $0x8] sm:$0xff]  ;;  %v79_v3 = vld [vmem:[#allocation8 + $0x18] sm:$0xff] }
  0x39   :  { %226 = vmatprep.mubr.f32.mxu0 %v2849_v0  ;;  %339 = vmatprep.mubr.f32.mxu1 %v2849_v0  ;;  %v81_v2 = vld [vmem:[#allocation8 + $0x28] sm:$0xff]  ;;  %v83_v5 = vld [vmem:[#allocation8 + $0x38] sm:$0xff]  ;;  %v76_v6 = vld [vmem:[#allocation8] sm:$0xff] }
  0x3a   :  { %v1946_v4 = vpack.c.bf16 %v81_v2, %v77_v1  ;;  %v80_v7 = vld [vmem:[#allocation8 + $0x20] sm:$0xff]  ;;  %v1978_v8 = vpack.c.bf16 %v83_v5, %v79_v3  ;;  %v78_v10 = vld [vmem:[#allocation8 + $0x10] sm:$0xff]  ;;  %v85_v12 = vld [vmem:[#allocation8 + $0x48] sm:$0xff] }
  0x3b   :  { %v1948_v9 = vpack.c.bf16 %v80_v7, %v76_v6  ;;  %v82_v11 = vld [vmem:[#allocation8 + $0x30] sm:$0xff]  ;;  %v89_v14 = vld [vmem:[#allocation8 + $0x68] sm:$0xff]  ;;  %v87_v15 = vld [vmem:[#allocation8 + $0x58] sm:$0xff] }
  0x3c   :  { %1947 = vmatprep.subr.bf16.mxu0 %v1946_v4  ;;  %v1980_v13 = vpack.c.bf16 %v82_v11, %v78_v10  ;;  %v91_v16 = vld [vmem:[#allocation8 + $0x78] sm:$0xff]  ;;  %1979 = vmatprep.subr.bf16.mxu1 %v1978_v8  ;;  %v1950_v17 = vpack.c.bf16 %v89_v14, %v85_v12  ;;  %v84_v19 = vld [vmem:[#allocation8 + $0x40] sm:$0xff]  ;;  %v86_v21 = vld [vmem:[#allocation8 + $0x50] sm:$0xff] }
  0x3d   :  { %1949 = vmatpush1.bf16.msra.mxu0 %v1948_v9  ;;  %v1982_v18 = vpack.c.bf16 %v91_v16, %v87_v15  ;;  %v88_v20 = vld [vmem:[#allocation8 + $0x60] sm:$0xff]  ;;  %v90_v23 = vld [vmem:[#allocation8 + $0x70] sm:$0xff]  ;;  %v93_v24 = vld [vmem:[#allocation8 + $0x88] sm:$0xff] }
  0x3e   :  { %1981 = vmatpush1.bf16.msra.mxu1 %v1980_v13  ;;  %v1952_v22 = vpack.c.bf16 %v88_v20, %v84_v19  ;;  %v97_v25 = vld [vmem:[#allocation8 + $0xa8] sm:$0xff]  ;;  %1951 = vmatprep.subr.bf16.mxu0 %v1950_v17  ;;  %v1984_v26 = vpack.c.bf16 %v90_v23, %v86_v21  ;;  %v95_v28 = vld [vmem:[#allocation8 + $0x98] sm:$0xff]  ;;  %v92_v30 = vld [vmem:[#allocation8 + $0x80] sm:$0xff] }
  0x3f   :  { %1983 = vmatprep.subr.bf16.mxu1 %v1982_v18  ;;  %v1954_v27 = vpack.c.bf16 %v97_v25, %v93_v24  ;;  %v99_v29 = vld [vmem:[#allocation8 + $0xb8] sm:$0xff]  ;;  %v96_v32 = vld [vmem:[#allocation8 + $0xa0] sm:$0xff]  ;;  %v94_v33 = vld [vmem:[#allocation8 + $0x90] sm:$0xff] }
  0x40   :  { %v1986_v31 = vpack.c.bf16 %v99_v29, %v95_v28  ;;  %v98_v34 = vld [vmem:[#allocation8 + $0xb0] sm:$0xff]  ;;  %v1956_v35 = vpack.c.bf16 %v96_v32, %v92_v30  ;;  %v101_v36 = vld [vmem:[#allocation8 + $0xc8] sm:$0xff]  ;;  %v103_v38 = vld [vmem:[#allocation8 + $0xd8] sm:$0xff] }
  0x41   :  { %1953 = vmatpush1.bf16.msra.mxu0 %v1952_v22  ;;  %v105_v37 = vld [vmem:[#allocation8 + $0xe8] sm:$0xff]  ;;  %v1988_v39 = vpack.c.bf16 %v98_v34, %v94_v33  ;;  %v107_v41 = vld [vmem:[#allocation8 + $0xf8] sm:$0xff]  ;;  %v100_v42 = vld [vmem:[#allocation8 + $0xc0] sm:$0xff] }
  0x42   :  { %1985 = vmatpush1.bf16.msra.mxu1 %v1984_v26  ;;  %1955 = vmatprep.subr.bf16.mxu0 %v1954_v27  ;;  %v1958_v40 = vpack.c.bf16 %v105_v37, %v101_v36  ;;  %v104_v43 = vld [vmem:[#allocation8 + $0xe0] sm:$0xff]  ;;  %v1990_v44 = vpack.c.bf16 %v107_v41, %v103_v38  ;;  %v102_v45 = vld [vmem:[#allocation8 + $0xd0] sm:$0xff]  ;;  %v109_v47 = vld [vmem:[#allocation8 + $0x108] sm:$0xff] }
  0x43   :  { %1987 = vmatprep.subr.bf16.mxu1 %v1986_v31  ;;  %v106_v46 = vld [vmem:[#allocation8 + $0xf0] sm:$0xff]  ;;  %v113_v48 = vld [vmem:[#allocation8 + $0x128] sm:$0xff]  ;;  %v111_v49 = vld [vmem:[#allocation8 + $0x118] sm:$0xff]  ;;  %v1960_v51 = vpack.c.bf16 %v104_v43, %v100_v42 }
  0x44   :  { %v115_v50 = vld [vmem:[#allocation8 + $0x138] sm:$0xff]  ;;  %v1992_v52 = vpack.c.bf16 %v106_v46, %v102_v45  ;;  %v1962_v53 = vpack.c.bf16 %v113_v48, %v109_v47  ;;  %v108_v54 = vld [vmem:[#allocation8 + $0x100] sm:$0xff]  ;;  %v110_v56 = vld [vmem:[#allocation8 + $0x110] sm:$0xff] }
  0x45   :  { %1957 = vmatpush1.bf16.msra.mxu0 %v1956_v35  ;;  %v112_v55 = vld [vmem:[#allocation8 + $0x120] sm:$0xff]  ;;  %v1994_v57 = vpack.c.bf16 %v115_v50, %v111_v49  ;;  %v114_v58 = vld [vmem:[#allocation8 + $0x130] sm:$0xff]  ;;  %v117_v59 = vld [vmem:[#allocation8 + $0x148] sm:$0xff] }
  0x46   :  { %1989 = vmatpush1.bf16.msra.mxu1 %v1988_v39  ;;  %1959 = vmatprep.subr.bf16.mxu0 %v1958_v40  ;;  %v121_v60 = vld [vmem:[#allocation8 + $0x168] sm:$0xff]  ;;  %v119_v61 = vld [vmem:[#allocation8 + $0x158] sm:$0xff]  ;;  %v1964_v63 = vpack.c.bf16 %v112_v55, %v108_v54  ;;  %v1996_v1 = vpack.c.bf16 %v114_v58, %v110_v56  ;;  %v116_v3 = vld [vmem:[#allocation8 + $0x140] sm:$0xff] }
  0x47   :  { %1991 = vmatprep.subr.bf16.mxu1 %v1990_v44  ;;  %v123_v62 = vld [vmem:[#allocation8 + $0x178] sm:$0xff]  ;;  %v1966_v2 = vpack.c.bf16 %v121_v60, %v117_v59  ;;  %v120_v4 = vld [vmem:[#allocation8 + $0x160] sm:$0xff]  ;;  %v118_v5 = vld [vmem:[#allocation8 + $0x150] sm:$0xff] }
  0x48   :  { %v1998_v6 = vpack.c.bf16 %v123_v62, %v119_v61  ;;  %v122_v7 = vld [vmem:[#allocation8 + $0x170] sm:$0xff]  ;;  %v125_v8 = vld [vmem:[#allocation8 + $0x188] sm:$0xff]  ;;  %v127_v10 = vld [vmem:[#allocation8 + $0x198] sm:$0xff]  ;;  %v1968_v12 = vpack.c.bf16 %v120_v4, %v116_v3 }
  0x49   :  { %1961 = vmatpush1.bf16.msra.mxu0 %v1960_v51  ;;  %v129_v9 = vld [vmem:[#allocation8 + $0x1a8] sm:$0xff]  ;;  %v131_v11 = vld [vmem:[#allocation8 + $0x1b8] sm:$0xff]  ;;  %v2000_v13 = vpack.c.bf16 %v122_v7, %v118_v5  ;;  %v124_v15 = vld [vmem:[#allocation8 + $0x180] sm:$0xff] }
  0x4a   :  { %1993 = vmatpush1.bf16.msra.mxu1 %v1992_v52  ;;  %1963 = vmatprep.subr.bf16.mxu0 %v1962_v53  ;;  %v1970_v14 = vpack.c.bf16 %v129_v9, %v125_v8  ;;  %v128_v16 = vld [vmem:[#allocation8 + $0x1a0] sm:$0xff]  ;;  %v126_v17 = vld [vmem:[#allocation8 + $0x190] sm:$0xff]  ;;  %v2002_v18 = vpack.c.bf16 %v131_v11, %v127_v10  ;;  %v133_v20 = vld [vmem:[#allocation8 + $0x1c8] sm:$0xff] }
  0x4b   :  { %1995 = vmatprep.subr.bf16.mxu1 %v1994_v57  ;;  %v130_v19 = vld [vmem:[#allocation8 + $0x1b0] sm:$0xff]  ;;  %v137_v21 = vld [vmem:[#allocation8 + $0x1e8] sm:$0xff]  ;;  %v135_v22 = vld [vmem:[#allocation8 + $0x1d8] sm:$0xff]  ;;  %v1972_v24 = vpack.c.bf16 %v128_v16, %v124_v15 }
  0x4c   :  { %v139_v23 = vld [vmem:[#allocation8 + $0x1f8] sm:$0xff]  ;;  %v2004_v25 = vpack.c.bf16 %v130_v19, %v126_v17  ;;  %v1974_v26 = vpack.c.bf16 %v137_v21, %v133_v20  ;;  %v132_v27 = vld [vmem:[#allocation8 + $0x1c0] sm:$0xff]  ;;  %v134_v29 = vld [vmem:[#allocation8 + $0x1d0] sm:$0xff] }
  0x4d   :  { %1965 = vmatpush1.bf16.msra.mxu0 %v1964_v63  ;;  %v136_v28 = vld [vmem:[#allocation8 + $0x1e0] sm:$0xff]  ;;  %v2006_v30 = vpack.c.bf16 %v139_v23, %v135_v22  ;;  %v138_v31 = vld [vmem:[#allocation8 + $0x1f0] sm:$0xff]  ;;  %v421_v32 = vld [vmem:[#allocation10 + $0x8] sm:$0xff] }
  0x4e   :  { %1997 = vmatpush1.bf16.msra.mxu1 %v1996_v1  ;;  %1967 = vmatprep.subr.bf16.mxu0 %v1966_v2  ;;  %v425_v33 = vld [vmem:[#allocation10 + $0x28] sm:$0xff]  ;;  %v423_v34 = vld [vmem:[#allocation10 + $0x18] sm:$0xff]  ;;  %v1976_v36 = vpack.c.bf16 %v136_v28, %v132_v27  ;;  %v2008_v37 = vpack.c.bf16 %v138_v31, %v134_v29  ;;  %v420_v39 = vld [vmem:[#allocation10] sm:$0xff] }
  0x4f   :  { %1999 = vmatprep.subr.bf16.mxu1 %v1998_v6  ;;  %v427_v35 = vld [vmem:[#allocation10 + $0x38] sm:$0xff]  ;;  %v2926_v38 = vpack.c.bf16 %v425_v33, %v421_v32  ;;  %v424_v40 = vld [vmem:[#allocation10 + $0x20] sm:$0xff]  ;;  %v422_v42 = vld [vmem:[#allocation10 + $0x10] sm:$0xff] }
  0x50   :  { %v2928_v41 = vpack.c.bf16 %v427_v35, %v423_v34  ;;  %v426_v43 = vld [vmem:[#allocation10 + $0x30] sm:$0xff]  ;;  %v429_v44 = vld [vmem:[#allocation10 + $0x48] sm:$0xff]  ;;  %v68_v46 = vld [vmem:[#allocation5] sm:$0xff]  ;;  %v2930_v47 = vpack.c.bf16 %v424_v40, %v420_v39 }
  0x51   :  { %1969 = vmatpush1.bf16.msra.mxu0 %v1968_v12  ;;  %v433_v45 = vld [vmem:[#allocation10 + $0x68] sm:$0xff]  ;;  %v431_v48 = vld [vmem:[#allocation10 + $0x58] sm:$0xff]  ;;  %v2933_v50 = vpack.c.bf16 %v426_v43, %v422_v42  ;;  %v428_v51 = vld [vmem:[#allocation10 + $0x40] sm:$0xff] }
  0x52   :  { %2001 = vmatpush1.bf16.msra.mxu1 %v2000_v13  ;;  %1971 = vmatprep.subr.bf16.mxu0 %v1970_v14  ;;  %v435_v49 = vld [vmem:[#allocation10 + $0x78] sm:$0xff]  ;;  %v432_v52 = vld [vmem:[#allocation10 + $0x60] sm:$0xff]  ;;  %v2936_v53 = vpack.c.bf16 %v433_v45, %v429_v44  ;;  %v430_v54 = vld [vmem:[#allocation10 + $0x50] sm:$0xff] }
  0x53   :  { %2003 = vmatprep.subr.bf16.mxu1 %v2002_v18  ;;  %v434_v55 = vld [vmem:[#allocation10 + $0x70] sm:$0xff]  ;;  %v2938_v56 = vpack.c.bf16 %v435_v49, %v431_v48  ;;  %v437_v57 = vld [vmem:[#allocation10 + $0x88] sm:$0xff]  ;;  %v2941_v60 = vpack.c.bf16 %v432_v52, %v428_v51  ;;  %v439_v61 = vld [vmem:[#allocation10 + $0x98] sm:$0xff] }
  0x54   :  { %v441_v58 = vld [vmem:[#allocation10 + $0xa8] sm:$0xff]  ;;  %v443_v62 = vld [vmem:[#allocation10 + $0xb8] sm:$0xff]  ;;  %v2945_v63 = vpack.c.bf16 %v434_v55, %v430_v54  ;;  %v436_v1 = vld [vmem:[#allocation10 + $0x80] sm:$0xff] }
  0x55   :  { %1973 = vmatpush1.bf16.msra.mxu0 %v1972_v24  ;;  %v69_v59 = vld [vmem:[#allocation5 + $0x8] sm:$0xff]  ;;  %v440_v2 = vld [vmem:[#allocation10 + $0xa0] sm:$0xff]  ;;  %v2949_v3 = vpack.c.bf16 %v441_v58, %v437_v57  ;;  %v438_v4 = vld [vmem:[#allocation10 + $0x90] sm:$0xff]  ;;  %v2952_v6 = vpack.c.bf16 %v443_v62, %v439_v61 }
  0x56   :  { %2005 = vmatpush1.bf16.msra.mxu1 %v2004_v25  ;;  %1975 = vmatprep.subr.bf16.mxu0 %v1974_v26  ;;  %v442_v5 = vld [vmem:[#allocation10 + $0xb0] sm:$0xff]  ;;  %v445_v7 = vld [vmem:[#allocation10 + $0xc8] sm:$0xff]  ;;  %v2955_v10 = vpack.c.bf16 %v440_v2, %v436_v1  ;;  %v447_v11 = vld [vmem:[#allocation10 + $0xd8] sm:$0xff] }
  0x57   :  { %2007 = vmatprep.subr.bf16.mxu1 %v2006_v30  ;;  %v449_v8 = vld [vmem:[#allocation10 + $0xe8] sm:$0xff]  ;;  %v70_v9 = vld [vmem:[#allocation5 + $0x10] sm:$0xff]  ;;  %v451_v12 = vld [vmem:[#allocation10 + $0xf8] sm:$0xff]  ;;  %v2959_v13 = vpack.c.bf16 %v442_v5, %v438_v4 }
  0x58   :  { %v444_v14 = vld [vmem:[#allocation10 + $0xc0] sm:$0xff]  ;;  %v2963_v16 = vpack.c.bf16 %v449_v8, %v445_v7  ;;  %v446_v17 = vld [vmem:[#allocation10 + $0xd0] sm:$0xff]  ;;  %v2966_v19 = vpack.c.bf16 %v451_v12, %v447_v11  ;;  %v453_v20 = vld [vmem:[#allocation10 + $0x108] sm:$0xff] }
  0x59   :  { %1977 = vmatpush1.bf16.msra.mxu0 %v1976_v36  ;;  %v448_v15 = vld [vmem:[#allocation10 + $0xe0] sm:$0xff]  ;;  %v450_v18 = vld [vmem:[#allocation10 + $0xf0] sm:$0xff]  ;;  %v457_v21 = vld [vmem:[#allocation10 + $0x128] sm:$0xff] }
  0x5a   :  { %2009 = vmatpush1.bf16.msra.mxu1 %v2008_v37  ;;  %2011 = vmatprep.subr.bf16.mxu0 %v2926_v38  ;;  %v71_v22 = vld [vmem:[#allocation5 + $0x18] sm:$0xff]  ;;  %v2969_v23 = vpack.c.bf16 %v448_v15, %v444_v14  ;;  %v2973_v26 = vpack.c.bf16 %v450_v18, %v446_v17  ;;  %v452_v27 = vld [vmem:[#allocation10 + $0x100] sm:$0xff]  ;;  %v2977_v29 = vpack.c.bf16 %v457_v21, %v453_v20  ;;  %v454_v30 = vld [vmem:[#allocation10 + $0x110] sm:$0xff] }
  0x5b   :  { %2043 = vmatprep.subr.bf16.mxu1 %v2928_v41  ;;  %v455_v24 = vld [vmem:[#allocation10 + $0x118] sm:$0xff]  ;;  %v456_v28 = vld [vmem:[#allocation10 + $0x120] sm:$0xff]  ;;  %v458_v31 = vld [vmem:[#allocation10 + $0x130] sm:$0xff] }
  0x5c   :  { %227 = vmatmul.mubr.f32.vlgmr.msra.gmra.mrb[0].mxu0 %v68_v46  ;;  %v459_v25 = vld [vmem:[#allocation10 + $0x138] sm:$0xff]  ;;  %v461_v33 = vld [vmem:[#allocation10 + $0x148] sm:$0xff]  ;;  %v72_v35 = vld [vmem:[#allocation5 + $0x20] sm:$0xff]  ;;  %v2983_v36 = vpack.c.bf16 %v456_v28, %v452_v27  ;;  %v2987_v40 = vpack.c.bf16 %v458_v31, %v454_v30  ;;  %v142_v28 = vlaneseq }
  0x5d   :  { %340 = vmatmul.mubr.f32.vlgmr.msra.gmra.mrb[0].mxu1 %v68_v46  ;;  %2013 = vmatpush1.bf16.msra.mxu0 %v2930_v47  ;;  %v2980_v32 = vpack.c.bf16 %v459_v25, %v455_v24  ;;  %v465_v34 = vld [vmem:[#allocation10 + $0x168] sm:$0xff]  ;;  %v463_v37 = vld [vmem:[#allocation10 + $0x158] sm:$0xff]  ;;  %v460_v42 = vld [vmem:[#allocation10 + $0x140] sm:$0xff] }
  0x5e   :  { %2045 = vmatpush1.bf16.msra.mxu1 %v2933_v50  ;;  %232 = vmatprep.mubr.f32.mxu0 %v2849_v0  ;;  %v467_v39 = vld [vmem:[#allocation10 + $0x178] sm:$0xff]  ;;  %v464_v43 = vld [vmem:[#allocation10 + $0x160] sm:$0xff]  ;;  %v2991_v44 = vpack.c.bf16 %v465_v34, %v461_v33  ;;  %v462_v45 = vld [vmem:[#allocation10 + $0x150] sm:$0xff]  ;;  %v143_v30 = vshrl.u32 %v142_v28, 7 }
  0x5f   :  { %345 = vmatprep.mubr.f32.mxu1 %v2849_v0  ;;  %2015 = vmatprep.subr.bf16.mxu0 %v2936_v53  ;;  %v466_v46 = vld [vmem:[#allocation10 + $0x170] sm:$0xff]  ;;  %v2994_v48 = vpack.c.bf16 %v467_v39, %v463_v37  ;;  %v469_v49 = vld [vmem:[#allocation10 + $0x188] sm:$0xff]  ;;  %v2997_v54 = vpack.c.bf16 %v464_v43, %v460_v42  ;;  %v471_v55 = vld [vmem:[#allocation10 + $0x198] sm:$0xff] }
  0x60   :  { %233 = vmatmul.mubr.f32.gmra.mrb[2].mxu0 %v69_v59  ;;  %2047 = vmatprep.subr.bf16.mxu1 %v2938_v56  ;;  %v473_v51 = vld [vmem:[#allocation10 + $0x1a8] sm:$0xff]  ;;  %v475_v57 = vld [vmem:[#allocation10 + $0x1b8] sm:$0xff]  ;;  %v3001_v58 = vpack.c.bf16 %v466_v46, %v462_v45  ;;  %v472_v61 = vld [vmem:[#allocation10 + $0x1a0] sm:$0xff]  ;;  %v144_v31 = vsub.s32 0, %v143_v30  ;;  %v148_v34 = vsub.s32 1, %v143_v30  ;;  %v156_v42 = vsub.s32 3, %v143_v30 }
  0x61   :  { %346 = vmatmul.mubr.f32.gmra.mrb[2].mxu1 %v69_v59  ;;  %2017 = vmatpush1.bf16.msra.mxu0 %v2941_v60  ;;  %v73_v52 = vld [vmem:[#allocation5 + $0x28] sm:$0xff]  ;;  %v468_v59 = vld [vmem:[#allocation10 + $0x180] sm:$0xff]  ;;  %v3005_v62 = vpack.c.bf16 %v473_v51, %v469_v49  ;;  %v470_v1 = vld [vmem:[#allocation10 + $0x190] sm:$0xff]  ;;  %v3008_v4 = vpack.c.bf16 %v475_v57, %v471_v55 }
  0x62   :  { %2049 = vmatpush1.bf16.msra.mxu1 %v2945_v63  ;;  %238 = vmatprep.mubr.f32.mxu0 %v2849_v0  ;;  %v474_v2 = vld [vmem:[#allocation10 + $0x1b0] sm:$0xff]  ;;  %v477_v5 = vld [vmem:[#allocation10 + $0x1c8] sm:$0xff]  ;;  %v479_v11 = vld [vmem:[#allocation10 + $0x1d8] sm:$0xff] }
  0x63   :  { %351 = vmatprep.mubr.f32.mxu1 %v2849_v0  ;;  %2019 = vmatprep.subr.bf16.mxu0 %v2949_v3  ;;  %v481_v7 = vld [vmem:[#allocation10 + $0x1e8] sm:$0xff]  ;;  %v74_v8 = vld [vmem:[#allocation5 + $0x30] sm:$0xff]  ;;  %v483_v12 = vld [vmem:[#allocation10 + $0x1f8] sm:$0xff]  ;;  %v3015_v14 = vpack.c.bf16 %v474_v2, %v470_v1 }
  0x64   :  { %239 = vmatmul.mubr.f32.gmra.mrb[4].mxu0 %v70_v9  ;;  %2051 = vmatprep.subr.bf16.mxu1 %v2952_v6  ;;  %v476_v15 = vld [vmem:[#allocation10 + $0x1c0] sm:$0xff]  ;;  %v3019_v18 = vpack.c.bf16 %v481_v7, %v477_v5  ;;  %v478_v20 = vld [vmem:[#allocation10 + $0x1d0] sm:$0xff]  ;;  %v75_v24 = vld [vmem:[#allocation5 + $0x38] sm:$0xff] }
  0x65   :  { %352 = vmatmul.mubr.f32.gmra.mrb[4].mxu1 %v70_v9  ;;  %2021 = vmatpush1.bf16.msra.mxu0 %v2955_v10  ;;  %v3011_v9 = vpack.c.bf16 %v472_v61, %v468_v59  ;;  %v480_v17 = vld [vmem:[#allocation10 + $0x1e0] sm:$0xff]  ;;  %v482_v21 = vld [vmem:[#allocation10 + $0x1f0] sm:$0xff]  ;;  %v152_v59 = vsub.s32 2, %v143_v30 }
  0x66   :  { %2053 = vmatpush1.bf16.msra.mxu1 %v2959_v13  ;;  %244 = vmatprep.mubr.f32.mxu0 %v2849_v0  ;;  %v3025_v25 = vpack.c.bf16 %v480_v17, %v476_v15  ;;  %v3029_v27 = vpack.c.bf16 %v482_v21, %v478_v20  ;;  %v140_v33 = vld [vmem:[%s3372_s3] sm:$0xf]  ;;  %s2850_s3 = smov [#allocation12]  }
  0x67   :  { %357 = vmatprep.mubr.f32.mxu1 %v2849_v0  ;;  %2023 = vmatprep.subr.bf16.mxu0 %v2963_v16  ;;  %v3081_v37 = vrot.slane %v140_v33, %v148_v34  ;;  %v3085_v57 = vrot.slane %v140_v33, %v156_v42  ;;  %v3088_v1 = vrot.slane %v140_v33, %v152_v59  ;;  %s1908_s29 = sshll.u32 %s2850_s3, 4  ;;  %s1909_s29 = int_to_ptr.vmem [resolvable:$true] %s1908_s29 }
  0x68   :  { %245 = vmatmul.mubr.f32.gmra.mrb[6].mxu0 %v71_v22  ;;  %2055 = vmatprep.subr.bf16.mxu1 %v2966_v19  ;;  %s2790_s8 = scalar_lea.vmem %s1909_s29, 128  ;;  %p2795_p11 = scmp.lt.s32.totalorder %s1909_s29, %s1909_s29 }
  0x69   :  { %358 = vmatmul.mubr.f32.gmra.mrb[6].mxu1 %v71_v22  ;;  %2025 = vmatpush1.bf16.msra.mxu0 %v2969_v23  ;;  %v3022_v22 = vpack.c.bf16 %v483_v12, %v479_v11  ;;  %p2791_p10 = scmp.ne.s32.totalorder %s1909_s29, %s2790_s8  ;;  %p2796_p12 = scmp.lt.s32.totalorder %s2790_s8, %s2790_s8 }
  0x6a   :  { %2057 = vmatpush1.bf16.msra.mxu1 %v2973_v26  ;;  %250 = vmatprep.mubr.f32.mxu0 %v2849_v0 }
  0x6b   :  { %363 = vmatprep.mubr.f32.mxu1 %v2849_v0  ;;  %2027 = vmatprep.subr.bf16.mxu0 %v2977_v29  ;;  %p2797_p13 = por %p2796_p12, %p2795_p11 }
  0x6c   :  { %251 = vmatmul.mubr.f32.gmra.mrb[8].mxu0 %v72_v35  ;;  %2059 = vmatprep.subr.bf16.mxu1 %v2980_v32 }
  0x6d   :  { %364 = vmatmul.mubr.f32.gmra.mrb[8].mxu1 %v72_v35  ;;  %2029 = vmatpush1.bf16.msra.mxu0 %v2983_v36  ;;  %v3079_v35 = vrot.slane %v140_v33, %v144_v31  ;;  %p2798_p0 = pnand %p2797_p13, %p2791_p10 }
  0x6e   :  { %2061 = vmatpush1.bf16.msra.mxu1 %v2987_v40  ;;  %256 = vmatprep.mubr.f32.mxu0 %v2849_v0 }
  0x6f   :  { %369 = vmatprep.mubr.f32.mxu1 %v2849_v0  ;;  %2031 = vmatprep.subr.bf16.mxu0 %v2991_v44 }
  0x70   :  { %257 = vmatmul.mubr.f32.gmra.mrb[10].mxu0 %v73_v52  ;;  %2063 = vmatprep.subr.bf16.mxu1 %v2994_v48 }
  0x71   :  { %370 = vmatmul.mubr.f32.gmra.mrb[10].mxu1 %v73_v52  ;;  %2033 = vmatpush1.bf16.msra.mxu0 %v2997_v54 }
  0x72   :  { %2065 = vmatpush1.bf16.msra.mxu1 %v3001_v58  ;;  %262 = vmatprep.mubr.f32.mxu0 %v2849_v0 }
  0x73   :  { %375 = vmatprep.mubr.f32.mxu1 %v2849_v0  ;;  %2035 = vmatprep.subr.bf16.mxu0 %v3005_v62 }
  0x74   :  { %263 = vmatmul.mubr.f32.gmra.mrb[12].mxu0 %v74_v8  ;;  %2067 = vmatprep.subr.bf16.mxu1 %v3008_v4 }
  0x75   :  { %376 = vmatmul.mubr.f32.gmra.mrb[12].mxu1 %v74_v8  ;;  %2037 = vmatpush1.bf16.msra.mxu0 %v3011_v9 }
  0x76   :  { %2069 = vmatpush1.bf16.msra.mxu1 %v3015_v14  ;;  %268 = vmatprep.mubr.f32.mxu0 %v2849_v0 }
  0x77   :  { %381 = vmatprep.mubr.f32.mxu1 %v2849_v0  ;;  %2039 = vmatprep.subr.bf16.mxu0 %v3019_v18 }
  0x78   :  { %269 = vmatmul.mubr.f32.gmra.mrb[14].mxu0 %v75_v24  ;;  %2071 = vmatprep.subr.bf16.mxu1 %v3022_v22 }
  0x79   :  { %382 = vmatmul.mubr.f32.gmra.mrb[14].mxu1 %v75_v24  ;;  %2041 = vmatpush1.bf16.msra.mxu0 %v3025_v25 }
  0x7a   :  { %2073 = vmatpush1.bf16.msra.mxu1 %v3029_v27  ;;  %554 = vmatprep.mubr.f32.mxu0 %v2849_v0 }
  0x7b   :  { %625 = vmatprep.mubr.f32.mxu1 %v2849_v0  ;;  %2075 = vmatprep.subr.bf16.mxu0 %v2926_v38 }
  0x7c   :  { %555 = vmatmul.mubr.f32.vlgmr.msra.gmra.mrb[0].mxu0 %v2849_v0  ;;  %2107 = vmatprep.subr.bf16.mxu1 %v2928_v41 }
  0x7d   :  { %626 = vmatmul.mubr.f32.vlgmr.msra.gmra.mrb[0].mxu1 %v2849_v0  ;;  %2077 = vmatpush1.bf16.msra.mxu0 %v2930_v47 }
  0x7e   :  { %2109 = vmatpush1.bf16.msra.mxu1 %v2933_v50  ;;  %2079 = vmatprep.subr.bf16.mxu0 %v2936_v53 }
  0x7f   :  { %2111 = vmatprep.subr.bf16.mxu1 %v2938_v56  ;;  %729 = vmatprep.mubr.f32.mxu0 %v2849_v0 }
  0x80   :  { %800 = vmatprep.mubr.f32.mxu1 %v2849_v0 }
  0x81   :  { %2081 = vmatpush1.bf16.msra.mxu0 %v2941_v60 }
  0x82   :  { %2113 = vmatpush1.bf16.msra.mxu1 %v2945_v63  ;;  %2083 = vmatprep.subr.bf16.mxu0 %v2949_v3 }
  0x83   :  { %2115 = vmatprep.subr.bf16.mxu1 %v2952_v6 }
  0x85   :  { %2085 = vmatpush1.bf16.msra.mxu0 %v2955_v10 }
  0x86   :  { %2117 = vmatpush1.bf16.msra.mxu1 %v2959_v13  ;;  %2087 = vmatprep.subr.bf16.mxu0 %v2963_v16 }
  0x87   :  { %2119 = vmatprep.subr.bf16.mxu1 %v2966_v19 }
  0x89   :  { %2089 = vmatpush1.bf16.msra.mxu0 %v2969_v23 }
  0x8a   :  { %2121 = vmatpush1.bf16.msra.mxu1 %v2973_v26  ;;  %2091 = vmatprep.subr.bf16.mxu0 %v2977_v29 }
  0x8b   :  { %2123 = vmatprep.subr.bf16.mxu1 %v2980_v32 }
  0x8d   :  { %2093 = vmatpush1.bf16.msra.mxu0 %v2983_v36 }
  0x8e   :  { %2125 = vmatpush1.bf16.msra.mxu1 %v2987_v40  ;;  %2095 = vmatprep.subr.bf16.mxu0 %v2991_v44 }
  0x8f   :  { %2127 = vmatprep.subr.bf16.mxu1 %v2994_v48 }
  0x91   :  { %2097 = vmatpush1.bf16.msra.mxu0 %v2997_v54 }
  0x92   :  { %2129 = vmatpush1.bf16.msra.mxu1 %v3001_v58  ;;  %2099 = vmatprep.subr.bf16.mxu0 %v3005_v62 }
  0x93   :  { %2131 = vmatprep.subr.bf16.mxu1 %v3008_v4 }
  0x95   :  { %2101 = vmatpush1.bf16.msra.mxu0 %v3011_v9 }
  0x96   :  { %2133 = vmatpush1.bf16.msra.mxu1 %v3015_v14  ;;  %2103 = vmatprep.subr.bf16.mxu0 %v3019_v18 }
  0x97   :  { %2135 = vmatprep.subr.bf16.mxu1 %v3022_v22 }
  0x99   :  { %2105 = vmatpush1.bf16.msra.mxu0 %v3025_v25 }
  0x9a   :  { %2137 = vmatpush1.bf16.msra.mxu1 %v3029_v27  ;;  %2139 = vmatprep.subr.bf16.mxu0 %v2926_v38 }
  0x9b   :  { %2171 = vmatprep.subr.bf16.mxu1 %v2928_v41 }
 0x14f   :  { %v556_v39 = vpop.f32.mrb[0].mxu0 }
 0x150   :  { %v2522_v43 = vadd.f32 %v556_v39, %v3079_v35  ;;  %v627_v45 = vpop.f32.mrb[0].mxu1  ;;  %v558_v46 = vpop.f32.mrb[1].mxu0 }
 0x151   :  { %v2523_v49 = vadd.f32 %v558_v46, %v3081_v37  ;;  %v629_v51 = vpop.f32.mrb[1].mxu1  ;;  %v2538_v5 = vadd.f32 %v627_v45, %v3088_v1 }
 0x152   :  { %v1922_v52 = vmul.f32 -1.442695, %v2522_v43  ;;  %v2539_v61 = vadd.f32 %v629_v51, %v3085_v57 }
 0x153   :  { %v1923_v55 = vmul.f32 -1.442695, %v2523_v49 }
 0x154   :  { %2596 = vpow2.f32 %v1922_v52  ;;  %v1924_v2 = vmul.f32 -1.442695, %v2539_v61 }
 0x155   :  { %2598 = vpow2.f32 %v1923_v55 }
 0x156   :  { %2600 = vpow2.f32 %v1924_v2 }
 0x157   :  { %2602 = vtanh.f32 %v2538_v5 }
 0x15e   :  { %v2597_v7 = vpop.eup %2596 }
 0x15f   :  { %v2599_v8 = vpop.eup %2598  ;;  %v639_v11 = vadd.f32 1.0, %v2597_v7 }
 0x160   :  { %v645_v12 = vadd.f32 1.0, %v2599_v8  ;;  %v2601_v15 = vpop.eup %2600 }
 0x161   :  { %2604 = vrcp.f32 %v639_v11  ;;  %v2603_v17 = vpop.eup %2602  ;;  %v652_v28 = vadd.f32 1.0, %v2601_v15 }
 0x162   :  { %2606 = vrcp.f32 %v645_v12 }
 0x163   :  { %2608 = vrcp.f32 %v652_v28 }
 0x16b   :  { %v2605_v20 = vpop.eup %2604 }
 0x16c   :  { %v2607_v21 = vpop.eup %2606  ;;  %v656_v24 = vmul.f32 %v2605_v20, %v2603_v17 }
 0x16d   :  { %v655_v30 = vmul.f32 0.0, %v2607_v21  ;;  %v2609_v33 = vpop.eup %2608 }
 0x16f   :  { %v3091_v31 = vadd.f32 %v656_v24, %v655_v30 }
 0x171   :  { %2610 = vtanh.f32 %v3091_v31 }
 0x17b   :  { %v2611_v34 = vpop.eup %2610 }
 0x17c   :  { %v659_v39 = vmul.f32 %v2611_v34, %v2609_v33 }
 0x17e   :  { %730 = vmatmul.mubr.f32.vlgmr.msra.gmra.mrb[2].mxu0 %v659_v39  ;;  %801 = vmatmul.mubr.f32.vlgmr.msra.gmra.mrb[2].mxu1 %v659_v39 }
 0x17f   :  { %2141 = vmatpush1.bf16.msra.mxu0 %v2930_v47  ;;  %2173 = vmatpush1.bf16.msra.mxu1 %v2933_v50 }
 0x180   :  { %2143 = vmatprep.subr.bf16.mxu0 %v2936_v53  ;;  %2175 = vmatprep.subr.bf16.mxu1 %v2938_v56 }
 0x181   :  { %904 = vmatprep.mubr.f32.mxu0 %v2849_v0  ;;  %975 = vmatprep.mubr.f32.mxu1 %v2849_v0 }
 0x183   :  { %2145 = vmatpush1.bf16.msra.mxu0 %v2941_v60  ;;  %2177 = vmatpush1.bf16.msra.mxu1 %v2945_v63 }
 0x184   :  { %2147 = vmatprep.subr.bf16.mxu0 %v2949_v3  ;;  %2179 = vmatprep.subr.bf16.mxu1 %v2952_v6 }
 0x187   :  { %2149 = vmatpush1.bf16.msra.mxu0 %v2955_v10  ;;  %2181 = vmatpush1.bf16.msra.mxu1 %v2959_v13 }
 0x188   :  { %2151 = vmatprep.subr.bf16.mxu0 %v2963_v16  ;;  %2183 = vmatprep.subr.bf16.mxu1 %v2966_v19 }
 0x18b   :  { %2153 = vmatpush1.bf16.msra.mxu0 %v2969_v23  ;;  %2185 = vmatpush1.bf16.msra.mxu1 %v2973_v26 }
 0x18c   :  { %2155 = vmatprep.subr.bf16.mxu0 %v2977_v29  ;;  %2187 = vmatprep.subr.bf16.mxu1 %v2980_v32 }
 0x18f   :  { %2157 = vmatpush1.bf16.msra.mxu0 %v2983_v36  ;;  %2189 = vmatpush1.bf16.msra.mxu1 %v2987_v40 }
 0x190   :  { %2159 = vmatprep.subr.bf16.mxu0 %v2991_v44  ;;  %2191 = vmatprep.subr.bf16.mxu1 %v2994_v48 }
 0x193   :  { %2161 = vmatpush1.bf16.msra.mxu0 %v2997_v54  ;;  %2193 = vmatpush1.bf16.msra.mxu1 %v3001_v58 }
 0x194   :  { %2163 = vmatprep.subr.bf16.mxu0 %v3005_v62  ;;  %2195 = vmatprep.subr.bf16.mxu1 %v3008_v4 }
 0x197   :  { %2165 = vmatpush1.bf16.msra.mxu0 %v3011_v9  ;;  %2197 = vmatpush1.bf16.msra.mxu1 %v3015_v14 }
 0x198   :  { %2167 = vmatprep.subr.bf16.mxu0 %v3019_v18  ;;  %2199 = vmatprep.subr.bf16.mxu1 %v3022_v22 }
 0x19b   :  { %2169 = vmatpush1.bf16.msra.mxu0 %v3025_v25  ;;  %2201 = vmatpush1.bf16.msra.mxu1 %v3029_v27 }
 0x19c   :  { %2203 = vmatprep.subr.bf16.mxu0 %v2926_v38  ;;  %2235 = vmatprep.subr.bf16.mxu1 %v2928_v41 }
 0x251   :  { %v731_v42 = vpop.f32.mrb[2].mxu0  ;;  %v802_v43 = vpop.f32.mrb[2].mxu1 }
 0x252   :  { %v2524_v45 = vadd.f32 %v731_v42, %v3079_v35  ;;  %v733_v46 = vpop.f32.mrb[3].mxu0  ;;  %v804_v49 = vpop.f32.mrb[3].mxu1  ;;  %v2540_v2 = vadd.f32 %v802_v43, %v3088_v1 }
 0x253   :  { %v2525_v51 = vadd.f32 %v733_v46, %v3081_v37  ;;  %v2541_v59 = vadd.f32 %v804_v49, %v3085_v57 }
 0x254   :  { %v1925_v52 = vmul.f32 -1.442695, %v2524_v45 }
 0x255   :  { %v1926_v55 = vmul.f32 -1.442695, %v2525_v51  ;;  %v1927_v61 = vmul.f32 -1.442695, %v2541_v59 }
 0x256   :  { %2612 = vpow2.f32 %v1925_v52 }
 0x257   :  { %2614 = vpow2.f32 %v1926_v55 }
 0x258   :  { %2616 = vpow2.f32 %v1927_v61 }
 0x259   :  { %2618 = vtanh.f32 %v2540_v2 }
 0x260   :  { %v2613_v5 = vpop.eup %2612 }
 0x261   :  { %v2615_v7 = vpop.eup %2614  ;;  %v814_v8 = vadd.f32 1.0, %v2613_v5 }
 0x262   :  { %v820_v11 = vadd.f32 1.0, %v2615_v7  ;;  %v2617_v12 = vpop.eup %2616 }
 0x263   :  { %2620 = vrcp.f32 %v814_v8  ;;  %v2619_v15 = vpop.eup %2618  ;;  %v827_v24 = vadd.f32 1.0, %v2617_v12 }
 0x264   :  { %2622 = vrcp.f32 %v820_v11 }
 0x265   :  { %2624 = vrcp.f32 %v827_v24 }
 0x26d   :  { %v2621_v17 = vpop.eup %2620 }
 0x26e   :  { %v2623_v20 = vpop.eup %2622  ;;  %v831_v21 = vmul.f32 %v2621_v17, %v2619_v15 }
 0x26f   :  { %v830_v28 = vmul.f32 %v2623_v20, %v3091_v31  ;;  %v2625_v33 = vpop.eup %2624 }
 0x271   :  { %v3133_v30 = vadd.f32 %v831_v21, %v830_v28 }
 0x273   :  { %2626 = vtanh.f32 %v3133_v30 }
 0x27d   :  { %v2627_v34 = vpop.eup %2626 }
 0x27e   :  { %v834_v39 = vmul.f32 %v2627_v34, %v2625_v33 }
 0x280   :  { %905 = vmatmul.mubr.f32.vlgmr.msra.gmra.mrb[4].mxu0 %v834_v39  ;;  %976 = vmatmul.mubr.f32.vlgmr.msra.gmra.mrb[4].mxu1 %v834_v39 }
 0x281   :  { %2205 = vmatpush1.bf16.msra.mxu0 %v2930_v47  ;;  %2237 = vmatpush1.bf16.msra.mxu1 %v2933_v50 }
 0x282   :  { %2207 = vmatprep.subr.bf16.mxu0 %v2936_v53  ;;  %2239 = vmatprep.subr.bf16.mxu1 %v2938_v56 }
 0x283   :  { %1079 = vmatprep.mubr.f32.mxu0 %v2849_v0  ;;  %1150 = vmatprep.mubr.f32.mxu1 %v2849_v0 }
 0x285   :  { %2209 = vmatpush1.bf16.msra.mxu0 %v2941_v60  ;;  %2241 = vmatpush1.bf16.msra.mxu1 %v2945_v63 }
 0x286   :  { %2211 = vmatprep.subr.bf16.mxu0 %v2949_v3  ;;  %2243 = vmatprep.subr.bf16.mxu1 %v2952_v6 }
 0x289   :  { %2213 = vmatpush1.bf16.msra.mxu0 %v2955_v10  ;;  %2245 = vmatpush1.bf16.msra.mxu1 %v2959_v13 }
 0x28a   :  { %2215 = vmatprep.subr.bf16.mxu0 %v2963_v16  ;;  %2247 = vmatprep.subr.bf16.mxu1 %v2966_v19 }
 0x28d   :  { %2217 = vmatpush1.bf16.msra.mxu0 %v2969_v23  ;;  %2249 = vmatpush1.bf16.msra.mxu1 %v2973_v26 }
 0x28e   :  { %2219 = vmatprep.subr.bf16.mxu0 %v2977_v29  ;;  %2251 = vmatprep.subr.bf16.mxu1 %v2980_v32 }
 0x291   :  { %2221 = vmatpush1.bf16.msra.mxu0 %v2983_v36  ;;  %2253 = vmatpush1.bf16.msra.mxu1 %v2987_v40 }
 0x292   :  { %2223 = vmatprep.subr.bf16.mxu0 %v2991_v44  ;;  %2255 = vmatprep.subr.bf16.mxu1 %v2994_v48 }
 0x295   :  { %2225 = vmatpush1.bf16.msra.mxu0 %v2997_v54  ;;  %2257 = vmatpush1.bf16.msra.mxu1 %v3001_v58 }
 0x296   :  { %2227 = vmatprep.subr.bf16.mxu0 %v3005_v62  ;;  %2259 = vmatprep.subr.bf16.mxu1 %v3008_v4 }
 0x299   :  { %2229 = vmatpush1.bf16.msra.mxu0 %v3011_v9  ;;  %2261 = vmatpush1.bf16.msra.mxu1 %v3015_v14 }
 0x29a   :  { %2231 = vmatprep.subr.bf16.mxu0 %v3019_v18  ;;  %2263 = vmatprep.subr.bf16.mxu1 %v3022_v22 }
 0x29d   :  { %2233 = vmatpush1.bf16.msra.mxu0 %v3025_v25  ;;  %2265 = vmatpush1.bf16.msra.mxu1 %v3029_v27 }
 0x29e   :  { %2267 = vmatprep.subr.bf16.mxu0 %v2926_v38  ;;  %2299 = vmatprep.subr.bf16.mxu1 %v2928_v41 }
 0x353   :  { %v906_v31 = vpop.f32.mrb[4].mxu0  ;;  %v977_v42 = vpop.f32.mrb[4].mxu1 }
 0x354   :  { %v2526_v43 = vadd.f32 %v906_v31, %v3079_v35  ;;  %v908_v45 = vpop.f32.mrb[5].mxu0  ;;  %v979_v46 = vpop.f32.mrb[5].mxu1  ;;  %v2542_v61 = vadd.f32 %v977_v42, %v3088_v1 }
 0x355   :  { %v2527_v49 = vadd.f32 %v908_v45, %v3081_v37  ;;  %v2543_v55 = vadd.f32 %v979_v46, %v3085_v57 }
 0x356   :  { %v1928_v51 = vmul.f32 -1.442695, %v2526_v43 }
 0x357   :  { %v1929_v52 = vmul.f32 -1.442695, %v2527_v49  ;;  %v1930_v59 = vmul.f32 -1.442695, %v2543_v55 }
 0x358   :  { %2628 = vpow2.f32 %v1928_v51 }
 0x359   :  { %2630 = vpow2.f32 %v1929_v52 }
 0x35a   :  { %2632 = vpow2.f32 %v1930_v59 }
 0x35b   :  { %2634 = vtanh.f32 %v2542_v61 }
 0x362   :  { %v2629_v2 = vpop.eup %2628 }
 0x363   :  { %v2631_v5 = vpop.eup %2630  ;;  %v989_v7 = vadd.f32 1.0, %v2629_v2 }
 0x364   :  { %v995_v8 = vadd.f32 1.0, %v2631_v5  ;;  %v2633_v11 = vpop.eup %2632 }
 0x365   :  { %2636 = vrcp.f32 %v989_v7  ;;  %v2635_v12 = vpop.eup %2634  ;;  %v1002_v21 = vadd.f32 1.0, %v2633_v11 }
 0x366   :  { %2638 = vrcp.f32 %v995_v8 }
 0x367   :  { %2640 = vrcp.f32 %v1002_v21 }
 0x36f   :  { %v2637_v15 = vpop.eup %2636 }
 0x370   :  { %v2639_v17 = vpop.eup %2638  ;;  %v1006_v20 = vmul.f32 %v2637_v15, %v2635_v12 }
 0x371   :  { %v1005_v24 = vmul.f32 %v2639_v17, %v3133_v30  ;;  %v2641_v33 = vpop.eup %2640 }
 0x373   :  { %v3175_v28 = vadd.f32 %v1006_v20, %v1005_v24 }
 0x375   :  { %2642 = vtanh.f32 %v3175_v28 }
 0x37f   :  { %v2643_v34 = vpop.eup %2642 }
 0x380   :  { %v1009_v39 = vmul.f32 %v2643_v34, %v2641_v33 }
 0x382   :  { %1080 = vmatmul.mubr.f32.vlgmr.msra.gmra.mrb[6].mxu0 %v1009_v39  ;;  %1151 = vmatmul.mubr.f32.vlgmr.msra.gmra.mrb[6].mxu1 %v1009_v39 }
 0x383   :  { %2269 = vmatpush1.bf16.msra.mxu0 %v2930_v47  ;;  %2301 = vmatpush1.bf16.msra.mxu1 %v2933_v50 }
 0x384   :  { %2271 = vmatprep.subr.bf16.mxu0 %v2936_v53  ;;  %2303 = vmatprep.subr.bf16.mxu1 %v2938_v56 }
 0x385   :  { %1254 = vmatprep.mubr.f32.mxu0 %v2849_v0  ;;  %1325 = vmatprep.mubr.f32.mxu1 %v2849_v0 }
 0x387   :  { %2273 = vmatpush1.bf16.msra.mxu0 %v2941_v60  ;;  %2305 = vmatpush1.bf16.msra.mxu1 %v2945_v63 }
 0x388   :  { %2275 = vmatprep.subr.bf16.mxu0 %v2949_v3  ;;  %2307 = vmatprep.subr.bf16.mxu1 %v2952_v6 }
 0x38b   :  { %2277 = vmatpush1.bf16.msra.mxu0 %v2955_v10  ;;  %2309 = vmatpush1.bf16.msra.mxu1 %v2959_v13 }
 0x38c   :  { %2279 = vmatprep.subr.bf16.mxu0 %v2963_v16  ;;  %2311 = vmatprep.subr.bf16.mxu1 %v2966_v19 }
 0x38f   :  { %2281 = vmatpush1.bf16.msra.mxu0 %v2969_v23  ;;  %2313 = vmatpush1.bf16.msra.mxu1 %v2973_v26 }
 0x390   :  { %2283 = vmatprep.subr.bf16.mxu0 %v2977_v29  ;;  %2315 = vmatprep.subr.bf16.mxu1 %v2980_v32 }
 0x393   :  { %2285 = vmatpush1.bf16.msra.mxu0 %v2983_v36  ;;  %2317 = vmatpush1.bf16.msra.mxu1 %v2987_v40 }
 0x394   :  { %2287 = vmatprep.subr.bf16.mxu0 %v2991_v44  ;;  %2319 = vmatprep.subr.bf16.mxu1 %v2994_v48 }
 0x397   :  { %2289 = vmatpush1.bf16.msra.mxu0 %v2997_v54  ;;  %2321 = vmatpush1.bf16.msra.mxu1 %v3001_v58 }
 0x398   :  { %2291 = vmatprep.subr.bf16.mxu0 %v3005_v62  ;;  %2323 = vmatprep.subr.bf16.mxu1 %v3008_v4 }
 0x39b   :  { %2293 = vmatpush1.bf16.msra.mxu0 %v3011_v9  ;;  %2325 = vmatpush1.bf16.msra.mxu1 %v3015_v14 }
 0x39c   :  { %2295 = vmatprep.subr.bf16.mxu0 %v3019_v18  ;;  %2327 = vmatprep.subr.bf16.mxu1 %v3022_v22 }
 0x39f   :  { %2297 = vmatpush1.bf16.msra.mxu0 %v3025_v25  ;;  %2329 = vmatpush1.bf16.msra.mxu1 %v3029_v27 }
 0x3a0   :  { %2331 = vmatprep.subr.bf16.mxu0 %v2926_v38  ;;  %2363 = vmatprep.subr.bf16.mxu1 %v2928_v41 }
 0x455   :  { %v1081_v30 = vpop.f32.mrb[6].mxu0  ;;  %v1152_v31 = vpop.f32.mrb[6].mxu1 }
 0x456   :  { %v2528_v42 = vadd.f32 %v1081_v30, %v3079_v35  ;;  %v1083_v43 = vpop.f32.mrb[7].mxu0  ;;  %v1154_v45 = vpop.f32.mrb[7].mxu1  ;;  %v2544_v59 = vadd.f32 %v1152_v31, %v3088_v1 }
 0x457   :  { %v2529_v46 = vadd.f32 %v1083_v43, %v3081_v37  ;;  %v2545_v52 = vadd.f32 %v1154_v45, %v3085_v57 }
 0x458   :  { %v1931_v49 = vmul.f32 -1.442695, %v2528_v42 }
 0x459   :  { %v1932_v51 = vmul.f32 -1.442695, %v2529_v46  ;;  %v1933_v55 = vmul.f32 -1.442695, %v2545_v52 }
 0x45a   :  { %2644 = vpow2.f32 %v1931_v49 }
 0x45b   :  { %2646 = vpow2.f32 %v1932_v51 }
 0x45c   :  { %2648 = vpow2.f32 %v1933_v55 }
 0x45d   :  { %2650 = vtanh.f32 %v2544_v59 }
 0x464   :  { %v2645_v61 = vpop.eup %2644 }
 0x465   :  { %v2647_v2 = vpop.eup %2646  ;;  %v1164_v5 = vadd.f32 1.0, %v2645_v61 }
 0x466   :  { %v1170_v7 = vadd.f32 1.0, %v2647_v2  ;;  %v2649_v8 = vpop.eup %2648 }
 0x467   :  { %2652 = vrcp.f32 %v1164_v5  ;;  %v2651_v11 = vpop.eup %2650  ;;  %v1177_v20 = vadd.f32 1.0, %v2649_v8 }
 0x468   :  { %2654 = vrcp.f32 %v1170_v7 }
 0x469   :  { %2656 = vrcp.f32 %v1177_v20 }
 0x471   :  { %v2653_v12 = vpop.eup %2652 }
 0x472   :  { %v2655_v15 = vpop.eup %2654  ;;  %v1181_v17 = vmul.f32 %v2653_v12, %v2651_v11 }
 0x473   :  { %v1180_v21 = vmul.f32 %v2655_v15, %v3175_v28  ;;  %v2657_v33 = vpop.eup %2656 }
 0x475   :  { %v3217_v24 = vadd.f32 %v1181_v17, %v1180_v21 }
 0x477   :  { %2658 = vtanh.f32 %v3217_v24 }
 0x481   :  { %v2659_v34 = vpop.eup %2658 }
 0x482   :  { %v1184_v39 = vmul.f32 %v2659_v34, %v2657_v33 }
 0x484   :  { %1255 = vmatmul.mubr.f32.vlgmr.msra.gmra.mrb[8].mxu0 %v1184_v39  ;;  %1326 = vmatmul.mubr.f32.vlgmr.msra.gmra.mrb[8].mxu1 %v1184_v39 }
 0x485   :  { %2333 = vmatpush1.bf16.msra.mxu0 %v2930_v47  ;;  %2365 = vmatpush1.bf16.msra.mxu1 %v2933_v50 }
 0x486   :  { %2335 = vmatprep.subr.bf16.mxu0 %v2936_v53  ;;  %2367 = vmatprep.subr.bf16.mxu1 %v2938_v56 }
 0x487   :  { %1429 = vmatprep.mubr.f32.mxu0 %v2849_v0  ;;  %1500 = vmatprep.mubr.f32.mxu1 %v2849_v0 }
 0x489   :  { %2337 = vmatpush1.bf16.msra.mxu0 %v2941_v60  ;;  %2369 = vmatpush1.bf16.msra.mxu1 %v2945_v63 }
 0x48a   :  { %2339 = vmatprep.subr.bf16.mxu0 %v2949_v3  ;;  %2371 = vmatprep.subr.bf16.mxu1 %v2952_v6 }
 0x48d   :  { %2341 = vmatpush1.bf16.msra.mxu0 %v2955_v10  ;;  %2373 = vmatpush1.bf16.msra.mxu1 %v2959_v13 }
 0x48e   :  { %2343 = vmatprep.subr.bf16.mxu0 %v2963_v16  ;;  %2375 = vmatprep.subr.bf16.mxu1 %v2966_v19 }
 0x491   :  { %2345 = vmatpush1.bf16.msra.mxu0 %v2969_v23  ;;  %2377 = vmatpush1.bf16.msra.mxu1 %v2973_v26 }
 0x492   :  { %2347 = vmatprep.subr.bf16.mxu0 %v2977_v29  ;;  %2379 = vmatprep.subr.bf16.mxu1 %v2980_v32 }
 0x495   :  { %2349 = vmatpush1.bf16.msra.mxu0 %v2983_v36  ;;  %2381 = vmatpush1.bf16.msra.mxu1 %v2987_v40 }
 0x496   :  { %2351 = vmatprep.subr.bf16.mxu0 %v2991_v44  ;;  %2383 = vmatprep.subr.bf16.mxu1 %v2994_v48 }
 0x499   :  { %2353 = vmatpush1.bf16.msra.mxu0 %v2997_v54  ;;  %2385 = vmatpush1.bf16.msra.mxu1 %v3001_v58 }
 0x49a   :  { %2355 = vmatprep.subr.bf16.mxu0 %v3005_v62  ;;  %2387 = vmatprep.subr.bf16.mxu1 %v3008_v4 }
 0x49d   :  { %2357 = vmatpush1.bf16.msra.mxu0 %v3011_v9  ;;  %2389 = vmatpush1.bf16.msra.mxu1 %v3015_v14 }
 0x49e   :  { %2359 = vmatprep.subr.bf16.mxu0 %v3019_v18  ;;  %2391 = vmatprep.subr.bf16.mxu1 %v3022_v22 }
 0x4a1   :  { %2361 = vmatpush1.bf16.msra.mxu0 %v3025_v25  ;;  %2393 = vmatpush1.bf16.msra.mxu1 %v3029_v27 }
 0x4a2   :  { %2395 = vmatprep.subr.bf16.mxu0 %v2926_v38  ;;  %2427 = vmatprep.subr.bf16.mxu1 %v2928_v41 }
 0x557   :  { %v1256_v28 = vpop.f32.mrb[8].mxu0  ;;  %v1327_v30 = vpop.f32.mrb[8].mxu1 }
 0x558   :  { %v2530_v31 = vadd.f32 %v1256_v28, %v3079_v35  ;;  %v1258_v42 = vpop.f32.mrb[9].mxu0  ;;  %v1329_v43 = vpop.f32.mrb[9].mxu1  ;;  %v2546_v55 = vadd.f32 %v1327_v30, %v3088_v1 }
 0x559   :  { %v2531_v45 = vadd.f32 %v1258_v42, %v3081_v37  ;;  %v2547_v51 = vadd.f32 %v1329_v43, %v3085_v57 }
 0x55a   :  { %v1934_v46 = vmul.f32 -1.442695, %v2530_v31 }
 0x55b   :  { %v1935_v49 = vmul.f32 -1.442695, %v2531_v45  ;;  %v1936_v52 = vmul.f32 -1.442695, %v2547_v51 }
 0x55c   :  { %2660 = vpow2.f32 %v1934_v46 }
 0x55d   :  { %2662 = vpow2.f32 %v1935_v49 }
 0x55e   :  { %2664 = vpow2.f32 %v1936_v52 }
 0x55f   :  { %2666 = vtanh.f32 %v2546_v55 }
 0x566   :  { %v2661_v59 = vpop.eup %2660 }
 0x567   :  { %v2663_v61 = vpop.eup %2662  ;;  %v1339_v2 = vadd.f32 1.0, %v2661_v59 }
 0x568   :  { %v1345_v5 = vadd.f32 1.0, %v2663_v61  ;;  %v2665_v7 = vpop.eup %2664 }
 0x569   :  { %2668 = vrcp.f32 %v1339_v2  ;;  %v2667_v8 = vpop.eup %2666  ;;  %v1352_v17 = vadd.f32 1.0, %v2665_v7 }
 0x56a   :  { %2670 = vrcp.f32 %v1345_v5 }
 0x56b   :  { %2672 = vrcp.f32 %v1352_v17 }
 0x573   :  { %v2669_v11 = vpop.eup %2668 }
 0x574   :  { %v2671_v12 = vpop.eup %2670  ;;  %v1356_v15 = vmul.f32 %v2669_v11, %v2667_v8 }
 0x575   :  { %v1355_v20 = vmul.f32 %v2671_v12, %v3217_v24  ;;  %v2673_v33 = vpop.eup %2672 }
 0x577   :  { %v3259_v21 = vadd.f32 %v1356_v15, %v1355_v20 }
 0x579   :  { %2674 = vtanh.f32 %v3259_v21 }
 0x583   :  { %v2675_v34 = vpop.eup %2674 }
 0x584   :  { %v1359_v39 = vmul.f32 %v2675_v34, %v2673_v33 }
 0x586   :  { %1430 = vmatmul.mubr.f32.vlgmr.msra.gmra.mrb[10].mxu0 %v1359_v39  ;;  %1501 = vmatmul.mubr.f32.vlgmr.msra.gmra.mrb[10].mxu1 %v1359_v39 }
 0x587   :  { %2397 = vmatpush1.bf16.msra.mxu0 %v2930_v47  ;;  %2429 = vmatpush1.bf16.msra.mxu1 %v2933_v50 }
 0x588   :  { %2399 = vmatprep.subr.bf16.mxu0 %v2936_v53  ;;  %2431 = vmatprep.subr.bf16.mxu1 %v2938_v56 }
 0x589   :  { %1604 = vmatprep.mubr.f32.mxu0 %v2849_v0  ;;  %1675 = vmatprep.mubr.f32.mxu1 %v2849_v0 }
 0x58b   :  { %2401 = vmatpush1.bf16.msra.mxu0 %v2941_v60  ;;  %2433 = vmatpush1.bf16.msra.mxu1 %v2945_v63 }
 0x58c   :  { %2403 = vmatprep.subr.bf16.mxu0 %v2949_v3  ;;  %2435 = vmatprep.subr.bf16.mxu1 %v2952_v6 }
 0x58f   :  { %2405 = vmatpush1.bf16.msra.mxu0 %v2955_v10  ;;  %2437 = vmatpush1.bf16.msra.mxu1 %v2959_v13 }
 0x590   :  { %2407 = vmatprep.subr.bf16.mxu0 %v2963_v16  ;;  %2439 = vmatprep.subr.bf16.mxu1 %v2966_v19 }
 0x593   :  { %2409 = vmatpush1.bf16.msra.mxu0 %v2969_v23  ;;  %2441 = vmatpush1.bf16.msra.mxu1 %v2973_v26 }
 0x594   :  { %2411 = vmatprep.subr.bf16.mxu0 %v2977_v29  ;;  %2443 = vmatprep.subr.bf16.mxu1 %v2980_v32 }
 0x597   :  { %2413 = vmatpush1.bf16.msra.mxu0 %v2983_v36  ;;  %2445 = vmatpush1.bf16.msra.mxu1 %v2987_v40 }
 0x598   :  { %2415 = vmatprep.subr.bf16.mxu0 %v2991_v44  ;;  %2447 = vmatprep.subr.bf16.mxu1 %v2994_v48 }
 0x59b   :  { %2417 = vmatpush1.bf16.msra.mxu0 %v2997_v54  ;;  %2449 = vmatpush1.bf16.msra.mxu1 %v3001_v58 }
 0x59c   :  { %2419 = vmatprep.subr.bf16.mxu0 %v3005_v62  ;;  %2451 = vmatprep.subr.bf16.mxu1 %v3008_v4 }
 0x59f   :  { %2421 = vmatpush1.bf16.msra.mxu0 %v3011_v9  ;;  %2453 = vmatpush1.bf16.msra.mxu1 %v3015_v14 }
 0x5a0   :  { %2423 = vmatprep.subr.bf16.mxu0 %v3019_v18  ;;  %2455 = vmatprep.subr.bf16.mxu1 %v3022_v22 }
 0x5a3   :  { %2425 = vmatpush1.bf16.msra.mxu0 %v3025_v25  ;;  %2457 = vmatpush1.bf16.msra.mxu1 %v3029_v27 }
 0x5a4   :  { %2459 = vmatprep.subr.bf16.mxu0 %v2926_v38  ;;  %2491 = vmatprep.subr.bf16.mxu1 %v2928_v41 }
 0x659   :  { %v1431_v24 = vpop.f32.mrb[10].mxu0  ;;  %v1502_v28 = vpop.f32.mrb[10].mxu1 }
 0x65a   :  { %v2532_v30 = vadd.f32 %v1431_v24, %v3079_v35  ;;  %v1433_v31 = vpop.f32.mrb[11].mxu0  ;;  %v1504_v42 = vpop.f32.mrb[11].mxu1  ;;  %v2548_v52 = vadd.f32 %v1502_v28, %v3088_v1 }
 0x65b   :  { %v2533_v43 = vadd.f32 %v1433_v31, %v3081_v37  ;;  %v2549_v49 = vadd.f32 %v1504_v42, %v3085_v57 }
 0x65c   :  { %v1937_v45 = vmul.f32 -1.442695, %v2532_v30 }
 0x65d   :  { %v1938_v46 = vmul.f32 -1.442695, %v2533_v43  ;;  %v1939_v51 = vmul.f32 -1.442695, %v2549_v49 }
 0x65e   :  { %2676 = vpow2.f32 %v1937_v45 }
 0x65f   :  { %2678 = vpow2.f32 %v1938_v46 }
 0x660   :  { %2680 = vpow2.f32 %v1939_v51 }
 0x661   :  { %2682 = vtanh.f32 %v2548_v52 }
 0x668   :  { %v2677_v38 = vpop.eup %2676 }
 0x669   :  { %v2679_v55 = vpop.eup %2678  ;;  %v1514_v41 = vadd.f32 1.0, %v2677_v38 }
 0x66a   :  { %v1520_v59 = vadd.f32 1.0, %v2679_v55  ;;  %v2681_v61 = vpop.eup %2680 }
 0x66b   :  { %2684 = vrcp.f32 %v1514_v41  ;;  %v2683_v2 = vpop.eup %2682  ;;  %v1527_v11 = vadd.f32 1.0, %v2681_v61 }
 0x66c   :  { %2686 = vrcp.f32 %v1520_v59 }
 0x66d   :  { %2688 = vrcp.f32 %v1527_v11 }
 0x675   :  { %v2685_v5 = vpop.eup %2684 }
 0x676   :  { %v2687_v7 = vpop.eup %2686  ;;  %v1531_v8 = vmul.f32 %v2685_v5, %v2683_v2 }
 0x677   :  { %v1530_v12 = vmul.f32 %v2687_v7, %v3259_v21  ;;  %v2689_v17 = vpop.eup %2688 }
 0x679   :  { %v3301_v15 = vadd.f32 %v1531_v8, %v1530_v12 }
 0x67b   :  { %2690 = vtanh.f32 %v3301_v15 }
 0x685   :  { %v2691_v20 = vpop.eup %2690 }
 0x686   :  { %v1534_v33 = vmul.f32 %v2691_v20, %v2689_v17 }
 0x688   :  { %1605 = vmatmul.mubr.f32.vlgmr.msra.gmra.mrb[12].mxu0 %v1534_v33  ;;  %1676 = vmatmul.mubr.f32.vlgmr.msra.gmra.mrb[12].mxu1 %v1534_v33 }
 0x689   :  { %2461 = vmatpush1.bf16.msra.mxu0 %v2930_v47  ;;  %2493 = vmatpush1.bf16.msra.mxu1 %v2933_v50 }
 0x68a   :  { %2463 = vmatprep.subr.bf16.mxu0 %v2936_v53  ;;  %2495 = vmatprep.subr.bf16.mxu1 %v2938_v56 }
 0x68b   :  { %1779 = vmatprep.mubr.f32.mxu0 %v2849_v0  ;;  %1850 = vmatprep.mubr.f32.mxu1 %v2849_v0 }
 0x68d   :  { %2465 = vmatpush1.bf16.msra.mxu0 %v2941_v60  ;;  %2497 = vmatpush1.bf16.msra.mxu1 %v2945_v63 }
 0x68e   :  { %2467 = vmatprep.subr.bf16.mxu0 %v2949_v3  ;;  %2499 = vmatprep.subr.bf16.mxu1 %v2952_v6 }
 0x691   :  { %2469 = vmatpush1.bf16.msra.mxu0 %v2955_v10  ;;  %2501 = vmatpush1.bf16.msra.mxu1 %v2959_v13 }
 0x692   :  { %2471 = vmatprep.subr.bf16.mxu0 %v2963_v16  ;;  %2503 = vmatprep.subr.bf16.mxu1 %v2966_v19 }
 0x695   :  { %2473 = vmatpush1.bf16.msra.mxu0 %v2969_v23  ;;  %2505 = vmatpush1.bf16.msra.mxu1 %v2973_v26 }
 0x696   :  { %2475 = vmatprep.subr.bf16.mxu0 %v2977_v29  ;;  %2507 = vmatprep.subr.bf16.mxu1 %v2980_v32 }
 0x699   :  { %2477 = vmatpush1.bf16.msra.mxu0 %v2983_v36  ;;  %2509 = vmatpush1.bf16.msra.mxu1 %v2987_v40 }
 0x69a   :  { %2479 = vmatprep.subr.bf16.mxu0 %v2991_v44  ;;  %2511 = vmatprep.subr.bf16.mxu1 %v2994_v48 }
 0x69d   :  { %2481 = vmatpush1.bf16.msra.mxu0 %v2997_v54  ;;  %2513 = vmatpush1.bf16.msra.mxu1 %v3001_v58 }
 0x69e   :  { %2483 = vmatprep.subr.bf16.mxu0 %v3005_v62  ;;  %2515 = vmatprep.subr.bf16.mxu1 %v3008_v4 }
 0x6a1   :  { %2485 = vmatpush1.bf16.msra.mxu0 %v3011_v9  ;;  %2517 = vmatpush1.bf16.msra.mxu1 %v3015_v14 }
 0x6a2   :  { %2487 = vmatprep.subr.bf16.mxu0 %v3019_v18  ;;  %2519 = vmatprep.subr.bf16.mxu1 %v3022_v22 }
 0x6a5   :  { %2489 = vmatpush1.bf16.msra.mxu0 %v3025_v25  ;;  %2521 = vmatpush1.bf16.msra.mxu1 %v3029_v27 }
 0x75b   :  { %v1606_v0 = vpop.f32.mrb[12].mxu0  ;;  %v1677_v47 = vpop.f32.mrb[12].mxu1 }
 0x75c   :  { %v2534_v50 = vadd.f32 %v1606_v0, %v3079_v35  ;;  %v1608_v53 = vpop.f32.mrb[13].mxu0  ;;  %v1679_v56 = vpop.f32.mrb[13].mxu1  ;;  %v2550_v13 = vadd.f32 %v1677_v47, %v3088_v1 }
 0x75d   :  { %v2535_v60 = vadd.f32 %v1608_v53, %v3081_v37  ;;  %v2551_v6 = vadd.f32 %v1679_v56, %v3085_v57 }
 0x75e   :  { %v1940_v63 = vmul.f32 -1.442695, %v2534_v50 }
 0x75f   :  { %v1941_v3 = vmul.f32 -1.442695, %v2535_v60  ;;  %v1942_v10 = vmul.f32 -1.442695, %v2551_v6 }
 0x760   :  { %2692 = vpow2.f32 %v1940_v63 }
 0x761   :  { %2694 = vpow2.f32 %v1941_v3 }
 0x762   :  { %2696 = vpow2.f32 %v1942_v10 }
 0x763   :  { %2698 = vtanh.f32 %v2550_v13 }
 0x76a   :  { %v2693_v16 = vpop.eup %2692 }
 0x76b   :  { %v2695_v19 = vpop.eup %2694  ;;  %v1689_v23 = vadd.f32 1.0, %v2693_v16 }
 0x76c   :  { %v1695_v26 = vadd.f32 1.0, %v2695_v19  ;;  %v2697_v29 = vpop.eup %2696 }
 0x76d   :  { %2700 = vrcp.f32 %v1689_v23  ;;  %v2699_v32 = vpop.eup %2698  ;;  %v1702_v48 = vadd.f32 1.0, %v2697_v29 }
 0x76e   :  { %2702 = vrcp.f32 %v1695_v26 }
 0x76f   :  { %2704 = vrcp.f32 %v1702_v48 }
 0x777   :  { %v2701_v36 = vpop.eup %2700 }
 0x778   :  { %v2703_v40 = vpop.eup %2702  ;;  %v1706_v44 = vmul.f32 %v2701_v36, %v2699_v32 }
 0x779   :  { %v1705_v54 = vmul.f32 %v2703_v40, %v3301_v15  ;;  %v2705_v62 = vpop.eup %2704 }
 0x77b   :  { %v1707_v58 = vadd.f32 %v1706_v44, %v1705_v54 }
 0x77d   :  { %2706 = vtanh.f32 %v1707_v58 }
 0x787   :  { %v2707_v4 = vpop.eup %2706 }
 0x788   :  { %v1709_v9 = vmul.f32 %v2707_v4, %v2705_v62 }
 0x78a   :  { %1780 = vmatmul.mubr.f32.vlgmr.msra.gmra.mrb[14].mxu0 %v1709_v9  ;;  %1851 = vmatmul.mubr.f32.vlgmr.msra.gmra.mrb[14].mxu1 %v1709_v9 }
 0x85d   :  { %v1781_v14 = vpop.f32.mrb[14].mxu0  ;;  %v1852_v18 = vpop.f32.mrb[14].mxu1 }
 0x85e   :  { %v2536_v22 = vadd.f32 %v1781_v14, %v3079_v35  ;;  %v1783_v25 = vpop.f32.mrb[15].mxu0  ;;  %v1854_v27 = vpop.f32.mrb[15].mxu1  ;;  %v2552_v30 = vadd.f32 %v1852_v18, %v3088_v1 }
 0x85f   :  { %v2537_v21 = vadd.f32 %v1783_v25, %v3081_v37  ;;  %v2553_v24 = vadd.f32 %v1854_v27, %v3085_v57 }
 0x860   :  { %v1943_v34 = vmul.f32 -1.442695, %v2536_v22 }
 0x861   :  { %v1944_v39 = vmul.f32 -1.442695, %v2537_v21  ;;  %v1945_v28 = vmul.f32 -1.442695, %v2553_v24 }
 0x862   :  { %2708 = vpow2.f32 %v1943_v34 }
 0x863   :  { %2710 = vpow2.f32 %v1944_v39 }
 0x864   :  { %2712 = vpow2.f32 %v1945_v28 }
 0x865   :  { %2714 = vtanh.f32 %v2552_v30 }
 0x86c   :  { %v2709_v31 = vpop.eup %2708 }
 0x86d   :  { %v2711_v42 = vpop.eup %2710  ;;  %v1864_v43 = vadd.f32 1.0, %v2709_v31 }
 0x86e   :  { %v1870_v45 = vadd.f32 1.0, %v2711_v42  ;;  %v2713_v35 = vpop.eup %2712 }
 0x86f   :  { %2716 = vrcp.f32 %v1864_v43  ;;  %v2715_v46 = vpop.eup %2714  ;;  %v1877_v52 = vadd.f32 1.0, %v2713_v35 }
 0x870   :  { %2718 = vrcp.f32 %v1870_v45 }
 0x871   :  { %2720 = vrcp.f32 %v1877_v52 }
 0x879   :  { %v2717_v37 = vpop.eup %2716 }
 0x87a   :  { %v2719_v49 = vpop.eup %2718  ;;  %v1881_v51 = vmul.f32 %v2717_v37, %v2715_v46 }
 0x87b   :  { %v1880_v57 = vmul.f32 %v2719_v49, %v1707_v58 }
 0x87d   :  { %v1882_v38 = vadd.f32 %v1881_v51, %v1880_v57 }
 0x87f   :  { %2722 = vtanh.f32 %v1882_v38  ;;  %1891 = vst [vmem:[#allocation12] sm:$0xff] %v1882_v38 }
 0x880   :  { %2801 = shalt.err (!%p2798_p0)
}
 0x881   :  { %s2802_s11 = scalar_lea.hbm %s3374_s5, 128 }
 0x882   :  { %p2803_p1 = scmp.ne.s32.totalorder %s3374_s5, %s2802_s11  ;;  %p2806_p2 = scmp.lt.u32.totalorder %s2802_s11, %s3374_s5 }
 0x884   :  { %p2808_p3 = pnand %p2806_p2, %p2803_p1 }
 0x886   :  { %2811 = shalt.err (!%p2808_p3)
}
 0x887   :  { %1911 = dma.vmem_to_hbm [thread:$0]  %s1909_s29, 128, %s3374_s5, [#allocation13]   ;;  %v2721_v1 = vpop.eup %2720 }
 0x888   :  { %s2851_s17 = smov [#allocation11]  }
 0x889   :  { %s1898_s18 = sshll.u32 %s2851_s17, 4  ;;  %v2723_v55 = vpop.eup %2722  ;;  %s1899_s18 = int_to_ptr.vmem [resolvable:$true] %s1898_s18 }
 0x88a   :  { %v1884_v41 = vmul.f32 %v2723_v55, %v2721_v1  ;;  %s2812_s19 = scalar_lea.vmem %s1899_s18, 128  ;;  %p2817_p5 = scmp.lt.s32.totalorder %s1899_s18, %s1899_s18 }
 0x88b   :  { %p2813_p4 = scmp.ne.s32.totalorder %s1899_s18, %s2812_s19  ;;  %p2818_p6 = scmp.lt.s32.totalorder %s2812_s19, %s2812_s19 }
 0x88c   :  { %1890 = vst [vmem:[#allocation11] sm:$0xff] %v1884_v41 }
 0x88d   :  { %p2819_p7 = por %p2818_p6, %p2817_p5 }
 0x88f   :  { %p2820_p8 = pnand %p2819_p7, %p2813_p4 }
 0x891   :  { %2823 = shalt.err (!%p2820_p8)
}
 0x892   :  { %s2824_s22 = scalar_lea.hbm %s3373_s4, 128 }
 0x893   :  { %p2825_p9 = scmp.ne.s32.totalorder %s3373_s4, %s2824_s22  ;;  %p2828_p10 = scmp.lt.u32.totalorder %s2824_s22, %s3373_s4 }
 0x895   :  { %p2830_p11 = pnand %p2828_p10, %p2825_p9 }
 0x897   :  { %2833 = shalt.err (!%p2830_p11)
}
 0x898   :  { %1901 = dma.vmem_to_hbm [thread:$0]  %s1899_s18, 128, %s3373_s4, [#allocation7]  }
 0x899   :  { %2838 = dma.done.wait [#allocation7], 128  }
 0x89a   :  { %2839 = vsyncadd [#allocation7], 4294967168 }
 0x89b   :  { %2840 = dma.done.wait [#allocation13], 128  }
 0x89c   :  { %2841 = vsyncadd [#allocation13], 4294967168 }
 0x89d   :  { %1918 = vsyncpa [#allocation6], 1 }
 0x89e   :  { %1919 = vsyncpa [#allocation9], 1 }
 0x89f   :  { %1920 = vsyncpa [#allocation7], 1 }
 0x8a0   :  { %1921 = vsyncpa [#allocation13], 1 }

</bundles_post_ra>
